<compile_context>
chip_gen: v7x
topology: tpu7x:2x2x1
jax: 0.10.0
libtpu: 0.0.40
codegen_flags: <defaults>
</compile_context>

<pallas_src>
import functools

import jax
import jax.numpy as jnp
from jax.experimental import pallas as pl
from jax.experimental.pallas import tpu as pltpu


def _round_up(n, m):
    return (n + m - 1) // m * m


def _cdiv(a, b):
    return -(-a // b)


def fcnet_kernel(x_ref, w0_ref, b0_ref, wres_ref, bres_ref, wc_ref, out_ref, h_ref,
                 *, approx_sigmoid):
    # Features depend only on the batch tile -> compute once per batch tile (class tile 0)
    # and keep them in VMEM scratch for the remaining class tiles.
    @pl.when(pl.program_id(1) == 0)
    def _():
        x = x_ref[...]
        # feats[0]: Linear(num_inputs, num_filts) + ReLU (f32 accumulation, f32 elementwise)
        h = jnp.dot(x, w0_ref[...], preferred_element_type=jnp.float32) + b0_ref[...]
        h = jnp.maximum(h, 0.0)

        # 4 ResLayers; weights stacked as (8, nf, nf) = [w1a, w1b, w2a, w2b, ...]
        for layer in range(4):
            wa = wres_ref[2 * layer]
            ba = bres_ref[2 * layer]
            wb = wres_ref[2 * layer + 1]
            bb = bres_ref[2 * layer + 1]

            y = jnp.dot(h.astype(wa.dtype), wa, preferred_element_type=jnp.float32) + ba
            y = jnp.maximum(y, 0.0)
            # nn.Dropout() is identity in eval mode (inference semantics).
            y = jnp.dot(y.astype(wb.dtype), wb, preferred_element_type=jnp.float32) + bb
            y = jnp.maximum(y, 0.0)
            h = h + y

        h_ref[...] = h

    # class_emb: Linear(num_filts, num_classes, bias=False) (include_bias=0), one class tile.
    logits = jnp.dot(h_ref[...].astype(wc_ref.dtype), wc_ref[...],
                     preferred_element_type=jnp.float32)

    # sigmoid(x) = 1 / (1 + exp(-x)):  exp on the EUP; approx reciprocal keeps the epilogue
    # off the VPU precise-divide path (bf16 path); the exact f32 path uses precise recip.
    one_plus_e = 1.0 + jnp.exp(-logits)
    out_ref[...] = pl.reciprocal(one_plus_e, approx=approx_sigmoid).astype(out_ref.dtype)


def fcnet_forward(x, params, *, tile_b=2048, tile_c=2048,
                  compute_dtype=jnp.bfloat16, out_dtype=jnp.bfloat16,
                  vmem_limit_bytes=48 * 1024 * 1024):
    """x: (B, num_inputs) f32.  params: dict of pre-transposed (in, out) weights/biases.

    Returns (B, num_classes) sigmoid class predictions in `out_dtype`.
    """
    B, num_inputs = x.shape
    num_filts = params["w0"].shape[1]
    num_classes = params["wc"].shape[1]

    compute_dtype = jnp.dtype(compute_dtype)
    is_bf16 = compute_dtype == jnp.dtype(jnp.bfloat16)
    bias_dtype = jnp.float32  # biases / elementwise stay f32 regardless of matmul dtype

    # ---- pad feature/class dims to full 128-lane width (exact: zero padding only) ----
    nf_p = _round_up(num_filts, 128)
    tile_c = _round_up(min(tile_c, _round_up(num_classes, 128)), 128)
    nc_p = _round_up(_round_up(num_classes, 128), tile_c)

    def pad2(a, rows, cols):
        return jnp.pad(a, ((0, rows - a.shape[0]), (0, cols - a.shape[1])))

    w0 = pad2(params["w0"], num_inputs, nf_p).astype(compute_dtype)
    b0 = pad2(params["b0"], 1, nf_p).astype(bias_dtype)
    wres = jnp.stack(
        [pad2(params[f"w{l}{s}"], nf_p, nf_p) for l in range(1, 5) for s in ("a", "b")]
    ).astype(compute_dtype)
    bres = jnp.stack(
        [pad2(params[f"b{l}{s}"], 1, nf_p) for l in range(1, 5) for s in ("a", "b")]
    ).astype(bias_dtype)
    wc = pad2(params["wc"], nf_p, nc_p).astype(compute_dtype)

    # ---- batch tiling ----
    # Big tiles amortize the ~0.35us/step overhead, but keep >=4 grid steps when the batch
    # allows, so a v7x megacore gets >=2 steps per TensorCore and the pipeline can overlap.
    sub = 16 if is_bf16 else 8
    min_tiles = 4
    tile_b = min(tile_b, _round_up(max(_cdiv(B, min_tiles), sub), sub))
    tile_b = max(_round_up(tile_b, sub), sub)
    Bp = _round_up(B, tile_b)

    xp = x.astype(compute_dtype)
    if Bp != B:
        xp = jnp.pad(xp, ((0, Bp - B), (0, 0)))

    grid = (Bp // tile_b, nc_p // tile_c)

    def x_map(i, j):        # batch-tiled input, constant across class tiles
        return (i, 0)

    def out_map(i, j):      # batch x class tiled output
        return (i, j)

    def fixed2(i, j):       # whole-array weights, resident across all steps
        return (0, 0)

    def fixed3(i, j):
        return (0, 0, 0)

    def const_spec(shape, index_map):
        # Constant-index weight blocks never re-fetch; single-buffer them to halve their
        # resident VMEM (important on v7x once num_filts/num_classes are realistic).
        try:
            return pl.BlockSpec(shape, index_map, pipeline_mode=pl.Buffered(1))
        except Exception:  # older jax without pipeline_mode: fall back to default buffering
            return pl.BlockSpec(shape, index_map)

    kernel = functools.partial(fcnet_kernel, approx_sigmoid=is_bf16)

    out_padded = pl.pallas_call(
        kernel,
        out_shape=jax.ShapeDtypeStruct((Bp, nc_p), out_dtype),
        grid_spec=pltpu.PrefetchScalarGridSpec(
            num_scalar_prefetch=0,
            grid=grid,
            in_specs=[
                pl.BlockSpec((tile_b, num_inputs), x_map),           # x (batch tiled)
                const_spec((num_inputs, nf_p), fixed2),              # w0
                const_spec((1, nf_p), fixed2),                       # b0
                const_spec((8, nf_p, nf_p), fixed3),                 # stacked res weights
                const_spec((8, 1, nf_p), fixed3),                    # stacked res biases
                pl.BlockSpec((nf_p, tile_c), lambda i, j: (0, j)),   # wc (class tiled)
            ],
            out_specs=pl.BlockSpec((tile_b, tile_c), out_map),
            scratch_shapes=[pltpu.VMEM((tile_b, nf_p), jnp.float32)],  # feats reuse
        ),
        compiler_params=pltpu.CompilerParams(
            dimension_semantics=("parallel", "arbitrary"),
            vmem_limit_bytes=vmem_limit_bytes,
        ),
    )(xp, w0, b0, wres, bres, wc)

    # slice off batch padding and lane padding of the class head
    return out_padded[:B, :num_classes]


def init_params(key, num_inputs, num_classes, num_filts):
    """Deterministic synthetic parameters (pre-transposed to (in, out))."""
    keys = jax.random.split(key, 32)
    ki = iter(range(32))

    def lin(kin, kout, kw, kb):
        w = jax.random.normal(keys[kw], (kin, kout), jnp.float32) * 0.1
        b = jax.random.normal(keys[kb], (1, kout), jnp.float32) * 0.1
        return w, b

    params = {}
    params["w0"], params["b0"] = lin(num_inputs, num_filts, next(ki), next(ki))
    for layer in range(1, 5):
        wa, ba = lin(num_filts, num_filts, next(ki), next(ki))
        wb, bb = lin(num_filts, num_filts, next(ki), next(ki))
        params[f"w{layer}a"], params[f"b{layer}a"] = wa, ba
        params[f"w{layer}b"], params[f"b{layer}b"] = wb, bb
    params["wc"] = jax.random.normal(keys[next(ki)], (num_filts, num_classes),
                                     jnp.float32) * 0.1
    return params


def fcnet_reference(x, params):
    h = jnp.maximum(x @ params["w0"] + params["b0"], 0.0)
    for layer in range(1, 5):
        y = jnp.maximum(h @ params[f"w{layer}a"] + params[f"b{layer}a"], 0.0)
        y = jnp.maximum(y @ params[f"w{layer}b"] + params[f"b{layer}b"], 0.0)
        h = h + y
    return jax.nn.sigmoid(h @ params["wc"])


if __name__ == "__main__":
    # Small model dims, batch big enough to show a 4-step parallel batch grid
    # (2 steps per TensorCore on v7x) with large lane-dense tiles.
    B, num_inputs, num_filts, num_classes = 512, 4, 32, 10

    key = jax.random.PRNGKey(0)
    kx, kp = jax.random.split(key)
    x = jax.random.normal(kx, (B, num_inputs), jnp.float32)
    params = init_params(kp, num_inputs, num_classes, num_filts)

    ref = fcnet_reference(x, params)

    # Exact f32 path (precise sigmoid reciprocal): validates the fused-kernel structure.
    out_f32 = jax.block_until_ready(
        fcnet_forward(x, params, compute_dtype=jnp.float32, out_dtype=jnp.float32))
    assert out_f32.shape == (B, num_classes)
    assert jnp.max(jnp.abs(out_f32 - ref)) < 1e-5

    # Default fast path: bf16 matmul operands + bf16 output (f32 accumulation inside),
    # recommended on v6e/v7x; bf16 writeback also halves the dominant HBM traffic on v5e.
    out_fast = jax.block_until_ready(fcnet_forward(x, params))
    assert out_fast.shape == (B, num_classes)
    assert out_fast.dtype == jnp.bfloat16
    assert jnp.max(jnp.abs(out_fast.astype(jnp.float32) - ref)) < 5e-2

    print("KERNEL_OK")
</pallas_src>

<mosaic_0001>
module attributes {stable_mosaic.version = 11 : i64} {
  func.func @fcnet_kernel(%arg0: i32, %arg1: i32, %arg2: memref<128x4xf32, #tpu.memory_space<vmem>>, %arg3: memref<4x128xf32, #tpu.memory_space<vmem>>, %arg4: memref<1x128xf32, #tpu.memory_space<vmem>>, %arg5: memref<8x128x128xf32, #tpu.memory_space<vmem>>, %arg6: memref<8x1x128xf32, #tpu.memory_space<vmem>>, %arg7: memref<128x128xf32, #tpu.memory_space<vmem>>, %arg8: memref<128x128xf32, #tpu.memory_space<vmem>>, %arg9: memref<128x128xf32, #tpu.memory_space<vmem>>) attributes {dimension_semantics = [#tpu.dimension_semantics<parallel>, #tpu.dimension_semantics<arbitrary>], iteration_bounds = array<i64: 4, 1>, scalar_prefetch = 0 : i64, scratch_operands = 1 : i64, tpu.core_type = #tpu.core_type<tc>, window_params = [{transform_indices = @transform_0, window_bounds = array<i64: 128, 4>}, {pipeline_mode = #tpu.pipeline_mode<synchronous>, transform_indices = @transform_1, window_bounds = array<i64: 4, 128>}, {pipeline_mode = #tpu.pipeline_mode<synchronous>, transform_indices = @transform_2, window_bounds = array<i64: 1, 128>}, {pipeline_mode = #tpu.pipeline_mode<synchronous>, transform_indices = @transform_3, window_bounds = array<i64: 8, 128, 128>}, {pipeline_mode = #tpu.pipeline_mode<synchronous>, transform_indices = @transform_4, window_bounds = array<i64: 8, 1, 128>}, {transform_indices = @transform_5, window_bounds = array<i64: 128, 128>}, {transform_indices = @transform_6, window_bounds = array<i64: 128, 128>}]} {
    %c0_i32 = arith.constant 0 : i32
    %0 = arith.cmpi eq, %arg1, %c0_i32 : i32
    %1 = arith.extui %0 : i1 to i32
    %c0_i32_0 = arith.constant 0 : i32
    %2 = arith.cmpi ne, %1, %c0_i32_0 : i32
    scf.if %2 {
      %c0_8 = arith.constant 0 : index
      %c0_9 = arith.constant 0 : index
      %13 = vector.load %arg2[%c0_8, %c0_9] : memref<128x4xf32, #tpu.memory_space<vmem>>, vector<128x4xf32>
      %c0_10 = arith.constant 0 : index
      %c0_11 = arith.constant 0 : index
      %14 = vector.load %arg3[%c0_10, %c0_11] : memref<4x128xf32, #tpu.memory_space<vmem>>, vector<4x128xf32>
      %cst_12 = arith.constant dense<0.000000e+00> : vector<128x128xf32>
      %15 = tpu.matmul %13, %14, %cst_12 {dimension_numbers = #tpu.dot_dimension_numbers<[1], [0], [0], [1], [0, 0, 1, 1], [], []>} : vector<128x4xf32>, vector<4x128xf32>, vector<128x128xf32> -> vector<128x128xf32>
      %c0_13 = arith.constant 0 : index
      %c0_14 = arith.constant 0 : index
      %16 = vector.load %arg4[%c0_13, %c0_14] : memref<1x128xf32, #tpu.memory_space<vmem>>, vector<1x128xf32>
      %17 = vector.broadcast %16 : vector<1x128xf32> to vector<128x128xf32>
      %18 = arith.addf %15, %17 : vector<128x128xf32>
      %cst_15 = arith.constant 0.000000e+00 : f32
      %19 = vector.broadcast %cst_15 : f32 to vector<128x128xf32>
      %20 = arith.maximumf %18, %19 : vector<128x128xf32>
      %c0_16 = arith.constant 0 : index
      %c0_17 = arith.constant 0 : index
      %c0_18 = arith.constant 0 : index
      %21 = vector.load %arg5[%c0_16, %c0_17, %c0_18] : memref<8x128x128xf32, #tpu.memory_space<vmem>>, vector<1x128x128xf32>
      %22 = vector.shape_cast %21 : vector<1x128x128xf32> to vector<128x128xf32>
      %c0_19 = arith.constant 0 : index
      %c0_20 = arith.constant 0 : index
      %c0_21 = arith.constant 0 : index
      %23 = vector.load %arg6[%c0_19, %c0_20, %c0_21] : memref<8x1x128xf32, #tpu.memory_space<vmem>>, vector<1x1x128xf32>
      %24 = vector.shape_cast %23 : vector<1x1x128xf32> to vector<1x128xf32>
      %c1 = arith.constant 1 : index
      %c0_22 = arith.constant 0 : index
      %c0_23 = arith.constant 0 : index
      %25 = vector.load %arg5[%c1, %c0_22, %c0_23] : memref<8x128x128xf32, #tpu.memory_space<vmem>>, vector<1x128x128xf32>
      %26 = vector.shape_cast %25 : vector<1x128x128xf32> to vector<128x128xf32>
      %c1_24 = arith.constant 1 : index
      %c0_25 = arith.constant 0 : index
      %c0_26 = arith.constant 0 : index
      %27 = vector.load %arg6[%c1_24, %c0_25, %c0_26] : memref<8x1x128xf32, #tpu.memory_space<vmem>>, vector<1x1x128xf32>
      %28 = vector.shape_cast %27 : vector<1x1x128xf32> to vector<1x128xf32>
      %cst_27 = arith.constant dense<0.000000e+00> : vector<128x128xf32>
      %29 = tpu.matmul %20, %22, %cst_27 {dimension_numbers = #tpu.dot_dimension_numbers<[1], [0], [0], [1], [0, 0, 1, 1], [], []>} : vector<128x128xf32>, vector<128x128xf32>, vector<128x128xf32> -> vector<128x128xf32>
      %30 = vector.broadcast %24 : vector<1x128xf32> to vector<128x128xf32>
      %31 = arith.addf %29, %30 : vector<128x128xf32>
      %cst_28 = arith.constant 0.000000e+00 : f32
      %32 = vector.broadcast %cst_28 : f32 to vector<128x128xf32>
      %33 = arith.maximumf %31, %32 : vector<128x128xf32>
      %cst_29 = arith.constant dense<0.000000e+00> : vector<128x128xf32>
      %34 = tpu.matmul %33, %26, %cst_29 {dimension_numbers = #tpu.dot_dimension_numbers<[1], [0], [0], [1], [0, 0, 1, 1], [], []>} : vector<128x128xf32>, vector<128x128xf32>, vector<128x128xf32> -> vector<128x128xf32>
      %35 = vector.broadcast %28 : vector<1x128xf32> to vector<128x128xf32>
      %36 = arith.addf %34, %35 : vector<128x128xf32>
      %cst_30 = arith.constant 0.000000e+00 : f32
      %37 = vector.broadcast %cst_30 : f32 to vector<128x128xf32>
      %38 = arith.maximumf %36, %37 : vector<128x128xf32>
      %39 = arith.addf %20, %38 : vector<128x128xf32>
      %c2 = arith.constant 2 : index
      %c0_31 = arith.constant 0 : index
      %c0_32 = arith.constant 0 : index
      %40 = vector.load %arg5[%c2, %c0_31, %c0_32] : memref<8x128x128xf32, #tpu.memory_space<vmem>>, vector<1x128x128xf32>
      %41 = vector.shape_cast %40 : vector<1x128x128xf32> to vector<128x128xf32>
      %c2_33 = arith.constant 2 : index
      %c0_34 = arith.constant 0 : index
      %c0_35 = arith.constant 0 : index
      %42 = vector.load %arg6[%c2_33, %c0_34, %c0_35] : memref<8x1x128xf32, #tpu.memory_space<vmem>>, vector<1x1x128xf32>
      %43 = vector.shape_cast %42 : vector<1x1x128xf32> to vector<1x128xf32>
      %c3 = arith.constant 3 : index
      %c0_36 = arith.constant 0 : index
      %c0_37 = arith.constant 0 : index
      %44 = vector.load %arg5[%c3, %c0_36, %c0_37] : memref<8x128x128xf32, #tpu.memory_space<vmem>>, vector<1x128x128xf32>
      %45 = vector.shape_cast %44 : vector<1x128x128xf32> to vector<128x128xf32>
      %c3_38 = arith.constant 3 : index
      %c0_39 = arith.constant 0 : index
      %c0_40 = arith.constant 0 : index
      %46 = vector.load %arg6[%c3_38, %c0_39, %c0_40] : memref<8x1x128xf32, #tpu.memory_space<vmem>>, vector<1x1x128xf32>
      %47 = vector.shape_cast %46 : vector<1x1x128xf32> to vector<1x128xf32>
      %cst_41 = arith.constant dense<0.000000e+00> : vector<128x128xf32>
      %48 = tpu.matmul %39, %41, %cst_41 {dimension_numbers = #tpu.dot_dimension_numbers<[1], [0], [0], [1], [0, 0, 1, 1], [], []>} : vector<128x128xf32>, vector<128x128xf32>, vector<128x128xf32> -> vector<128x128xf32>
      %49 = vector.broadcast %43 : vector<1x128xf32> to vector<128x128xf32>
      %50 = arith.addf %48, %49 : vector<128x128xf32>
      %cst_42 = arith.constant 0.000000e+00 : f32
      %51 = vector.broadcast %cst_42 : f32 to vector<128x128xf32>
      %52 = arith.maximumf %50, %51 : vector<128x128xf32>
      %cst_43 = arith.constant dense<0.000000e+00> : vector<128x128xf32>
      %53 = tpu.matmul %52, %45, %cst_43 {dimension_numbers = #tpu.dot_dimension_numbers<[1], [0], [0], [1], [0, 0, 1, 1], [], []>} : vector<128x128xf32>, vector<128x128xf32>, vector<128x128xf32> -> vector<128x128xf32>
      %54 = vector.broadcast %47 : vector<1x128xf32> to vector<128x128xf32>
      %55 = arith.addf %53, %54 : vector<128x128xf32>
      %cst_44 = arith.constant 0.000000e+00 : f32
      %56 = vector.broadcast %cst_44 : f32 to vector<128x128xf32>
      %57 = arith.maximumf %55, %56 : vector<128x128xf32>
      %58 = arith.addf %39, %57 : vector<128x128xf32>
      %c4 = arith.constant 4 : index
      %c0_45 = arith.constant 0 : index
      %c0_46 = arith.constant 0 : index
      %59 = vector.load %arg5[%c4, %c0_45, %c0_46] : memref<8x128x128xf32, #tpu.memory_space<vmem>>, vector<1x128x128xf32>
      %60 = vector.shape_cast %59 : vector<1x128x128xf32> to vector<128x128xf32>
      %c4_47 = arith.constant 4 : index
      %c0_48 = arith.constant 0 : index
      %c0_49 = arith.constant 0 : index
      %61 = vector.load %arg6[%c4_47, %c0_48, %c0_49] : memref<8x1x128xf32, #tpu.memory_space<vmem>>, vector<1x1x128xf32>
      %62 = vector.shape_cast %61 : vector<1x1x128xf32> to vector<1x128xf32>
      %c5 = arith.constant 5 : index
      %c0_50 = arith.constant 0 : index
      %c0_51 = arith.constant 0 : index
      %63 = vector.load %arg5[%c5, %c0_50, %c0_51] : memref<8x128x128xf32, #tpu.memory_space<vmem>>, vector<1x128x128xf32>
      %64 = vector.shape_cast %63 : vector<1x128x128xf32> to vector<128x128xf32>
      %c5_52 = arith.constant 5 : index
      %c0_53 = arith.constant 0 : index
      %c0_54 = arith.constant 0 : index
      %65 = vector.load %arg6[%c5_52, %c0_53, %c0_54] : memref<8x1x128xf32, #tpu.memory_space<vmem>>, vector<1x1x128xf32>
      %66 = vector.shape_cast %65 : vector<1x1x128xf32> to vector<1x128xf32>
      %cst_55 = arith.constant dense<0.000000e+00> : vector<128x128xf32>
      %67 = tpu.matmul %58, %60, %cst_55 {dimension_numbers = #tpu.dot_dimension_numbers<[1], [0], [0], [1], [0, 0, 1, 1], [], []>} : vector<128x128xf32>, vector<128x128xf32>, vector<128x128xf32> -> vector<128x128xf32>
      %68 = vector.broadcast %62 : vector<1x128xf32> to vector<128x128xf32>
      %69 = arith.addf %67, %68 : vector<128x128xf32>
      %cst_56 = arith.constant 0.000000e+00 : f32
      %70 = vector.broadcast %cst_56 : f32 to vector<128x128xf32>
      %71 = arith.maximumf %69, %70 : vector<128x128xf32>
      %cst_57 = arith.constant dense<0.000000e+00> : vector<128x128xf32>
      %72 = tpu.matmul %71, %64, %cst_57 {dimension_numbers = #tpu.dot_dimension_numbers<[1], [0], [0], [1], [0, 0, 1, 1], [], []>} : vector<128x128xf32>, vector<128x128xf32>, vector<128x128xf32> -> vector<128x128xf32>
      %73 = vector.broadcast %66 : vector<1x128xf32> to vector<128x128xf32>
      %74 = arith.addf %72, %73 : vector<128x128xf32>
      %cst_58 = arith.constant 0.000000e+00 : f32
      %75 = vector.broadcast %cst_58 : f32 to vector<128x128xf32>
      %76 = arith.maximumf %74, %75 : vector<128x128xf32>
      %77 = arith.addf %58, %76 : vector<128x128xf32>
      %c6 = arith.constant 6 : index
      %c0_59 = arith.constant 0 : index
      %c0_60 = arith.constant 0 : index
      %78 = vector.load %arg5[%c6, %c0_59, %c0_60] : memref<8x128x128xf32, #tpu.memory_space<vmem>>, vector<1x128x128xf32>
      %79 = vector.shape_cast %78 : vector<1x128x128xf32> to vector<128x128xf32>
      %c6_61 = arith.constant 6 : index
      %c0_62 = arith.constant 0 : index
      %c0_63 = arith.constant 0 : index
      %80 = vector.load %arg6[%c6_61, %c0_62, %c0_63] : memref<8x1x128xf32, #tpu.memory_space<vmem>>, vector<1x1x128xf32>
      %81 = vector.shape_cast %80 : vector<1x1x128xf32> to vector<1x128xf32>
      %c7 = arith.constant 7 : index
      %c0_64 = arith.constant 0 : index
      %c0_65 = arith.constant 0 : index
      %82 = vector.load %arg5[%c7, %c0_64, %c0_65] : memref<8x128x128xf32, #tpu.memory_space<vmem>>, vector<1x128x128xf32>
      %83 = vector.shape_cast %82 : vector<1x128x128xf32> to vector<128x128xf32>
      %c7_66 = arith.constant 7 : index
      %c0_67 = arith.constant 0 : index
      %c0_68 = arith.constant 0 : index
      %84 = vector.load %arg6[%c7_66, %c0_67, %c0_68] : memref<8x1x128xf32, #tpu.memory_space<vmem>>, vector<1x1x128xf32>
      %85 = vector.shape_cast %84 : vector<1x1x128xf32> to vector<1x128xf32>
      %cst_69 = arith.constant dense<0.000000e+00> : vector<128x128xf32>
      %86 = tpu.matmul %77, %79, %cst_69 {dimension_numbers = #tpu.dot_dimension_numbers<[1], [0], [0], [1], [0, 0, 1, 1], [], []>} : vector<128x128xf32>, vector<128x128xf32>, vector<128x128xf32> -> vector<128x128xf32>
      %87 = vector.broadcast %81 : vector<1x128xf32> to vector<128x128xf32>
      %88 = arith.addf %86, %87 : vector<128x128xf32>
      %cst_70 = arith.constant 0.000000e+00 : f32
      %89 = vector.broadcast %cst_70 : f32 to vector<128x128xf32>
      %90 = arith.maximumf %88, %89 : vector<128x128xf32>
      %cst_71 = arith.constant dense<0.000000e+00> : vector<128x128xf32>
      %91 = tpu.matmul %90, %83, %cst_71 {dimension_numbers = #tpu.dot_dimension_numbers<[1], [0], [0], [1], [0, 0, 1, 1], [], []>} : vector<128x128xf32>, vector<128x128xf32>, vector<128x128xf32> -> vector<128x128xf32>
      %92 = vector.broadcast %85 : vector<1x128xf32> to vector<128x128xf32>
      %93 = arith.addf %91, %92 : vector<128x128xf32>
      %cst_72 = arith.constant 0.000000e+00 : f32
      %94 = vector.broadcast %cst_72 : f32 to vector<128x128xf32>
      %95 = arith.maximumf %93, %94 : vector<128x128xf32>
      %96 = arith.addf %77, %95 : vector<128x128xf32>
      %c0_73 = arith.constant 0 : index
      %c0_74 = arith.constant 0 : index
      %97 = vector.load %arg9[%c0_73, %c0_74] : memref<128x128xf32, #tpu.memory_space<vmem>>, vector<128x128xf32>
      tpu.vector_store %arg9[%c0_73, %c0_74], %96 {strides = array<i32>} : memref<128x128xf32, #tpu.memory_space<vmem>>, vector<128x128xf32>,
    } else {
    }
    %c0 = arith.constant 0 : index
    %c0_1 = arith.constant 0 : index
    %3 = vector.load %arg9[%c0, %c0_1] : memref<128x128xf32, #tpu.memory_space<vmem>>, vector<128x128xf32>
    %c0_2 = arith.constant 0 : index
    %c0_3 = arith.constant 0 : index
    %4 = vector.load %arg7[%c0_2, %c0_3] : memref<128x128xf32, #tpu.memory_space<vmem>>, vector<128x128xf32>
    %cst = arith.constant dense<0.000000e+00> : vector<128x128xf32>
    %5 = tpu.matmul %3, %4, %cst {dimension_numbers = #tpu.dot_dimension_numbers<[1], [0], [0], [1], [0, 0, 1, 1], [], []>} : vector<128x128xf32>, vector<128x128xf32>, vector<128x128xf32> -> vector<128x128xf32>
    %cst_4 = arith.constant 0.000000e+00 : f32
    %6 = vector.broadcast %cst_4 : f32 to vector<128x128xf32>
    %7 = arith.subf %6, %5 : vector<128x128xf32>
    %8 = math.exp %7 : vector<128x128xf32>
    %cst_5 = arith.constant 1.000000e+00 : f32
    %9 = vector.broadcast %cst_5 : f32 to vector<128x128xf32>
    %10 = arith.addf %9, %8 : vector<128x128xf32>
    %11 = tpu.reciprocal %10 : vector<128x128xf32> -> vector<128x128xf32>
    %c0_6 = arith.constant 0 : index
    %c0_7 = arith.constant 0 : index
    %12 = vector.load %arg8[%c0_6, %c0_7] : memref<128x128xf32, #tpu.memory_space<vmem>>, vector<128x128xf32>
    tpu.vector_store %arg8[%c0_6, %c0_7], %11 {strides = array<i32>} : memref<128x128xf32, #tpu.memory_space<vmem>>, vector<128x128xf32>,
    return
  }
  func.func @transform_0(%arg0: i32, %arg1: i32) -> (i32, i32) {
    %c0_i32 = arith.constant 0 : i32
    %c0_i32_0 = arith.constant 0 : i32
    return %arg0, %c0_i32 : i32, i32
  }
  func.func @transform_1(%arg0: i32, %arg1: i32) -> (i32, i32) {
    %c0_i32 = arith.constant 0 : i32
    %c0_i32_0 = arith.constant 0 : i32
    %c0_i32_1 = arith.constant 0 : i32
    return %c0_i32, %c0_i32_0 : i32, i32
  }
  func.func @transform_2(%arg0: i32, %arg1: i32) -> (i32, i32) {
    %c0_i32 = arith.constant 0 : i32
    %c0_i32_0 = arith.constant 0 : i32
    %c0_i32_1 = arith.constant 0 : i32
    return %c0_i32, %c0_i32_0 : i32, i32
  }
  func.func @transform_3(%arg0: i32, %arg1: i32) -> (i32, i32, i32) {
    %c0_i32 = arith.constant 0 : i32
    %c0_i32_0 = arith.constant 0 : i32
    %c0_i32_1 = arith.constant 0 : i32
    %c0_i32_2 = arith.constant 0 : i32
    return %c0_i32, %c0_i32_0, %c0_i32_1 : i32, i32, i32
  }
  func.func @transform_4(%arg0: i32, %arg1: i32) -> (i32, i32, i32) {
    %c0_i32 = arith.constant 0 : i32
    %c0_i32_0 = arith.constant 0 : i32
    %c0_i32_1 = arith.constant 0 : i32
    %c0_i32_2 = arith.constant 0 : i32
    return %c0_i32, %c0_i32_0, %c0_i32_1 : i32, i32, i32
  }
  func.func @transform_5(%arg0: i32, %arg1: i32) -> (i32, i32) {
    %c0_i32 = arith.constant 0 : i32
    %c0_i32_0 = arith.constant 0 : i32
    return %c0_i32, %arg1 : i32, i32
  }
  func.func @transform_6(%arg0: i32, %arg1: i32) -> (i32, i32) {
    %c0_i32 = arith.constant 0 : i32
    return %arg0, %arg1 : i32, i32
  }
}

</mosaic_0001>

<bundles_post_ra>
// kernel: tpu_custom_call.1
= control target key start
LH: loop header
LB: loop body
LE: loop exit
PB: predicated region body
PF: predicated region fallthrough
CT: control target
= control target key end

     0   :  { %11 = vsyncpa [#allocation4], 0  ;;  %s4663_s0 = inlined_call_operand.vmem [shape: f32[512,4], index: 0, kind: input, shape index: {}]   ;;  %s4664_s1 = inlined_call_operand.vmem [shape: f32[4,128], index: 1, kind: input, shape index: {}]   ;;  %s4665_s2 = inlined_call_operand.vmem [shape: f32[1,128], index: 2, kind: input, shape index: {}]   ;;  %s4666_s3 = inlined_call_operand.hbm [shape: f32[8,128,128], index: 3, kind: input, shape index: {}]   ;;  %s4667_s4 = inlined_call_operand.vmem [shape: f32[8,1,128], index: 4, kind: input, shape index: {}]   ;;  %s4668_s5 = inlined_call_operand.vmem [shape: f32[128,128], index: 5, kind: input, shape index: {}]   ;;  %s4669_s6 = inlined_call_operand.hbm [shape: f32[512,128], index: 6, kind: output, shape index: {}]  }
   0x1   :  { %12 = vsyncpa [#allocation5], 0 }
   0x2   :  { %14 = vsyncpa [#allocation5 + $0x1], 0  ;;  %s3970_s21 = smov 0   ;;  %s3972_s22 = smov 0  }
   0x3   :  { %s3974_s23 = smov 0   ;;  %s3976_s24 = smov 0  }
   0x4   :  { %s3978_s25 = smov 0   ;;  %s3980_s26 = smov 0  }
   0x5 LB: > { %s2494_s27 = sadd.s32 4294967295, %s3927_s26   ;;  %s2495_s28 = sadd.s32 4294967294, %s3927_s26   ;;  %s3927_s26 = sphi %s3980_s26, %s20_s26   ;;  %s3923_s25 = sphi %s3978_s25, %s4687_s25   ;;  %s3919_s24 = sphi %s3976_s24, %s4686_s24   ;;  %s3915_s23 = sphi %s3974_s23, %s4685_s23   ;;  %s3911_s22 = sphi %s3972_s22, %s4684_s22   ;;  %s3907_s21 = sphi %s3970_s21, %s4683_s21  }
   0x6   : > { %s32_s29 = sadd.s32 1, %s3923_s25  ;;  %s177_s30 = sadd.s32 1, %s3915_s23 }
   0x7   : > { %p34_p0 = scmp.ge.s32.totalorder %s32_s29, 4  ;;  %p187_p1 = scmp.ne.s32.totalorder %s3915_s23, %s3911_s22 }
   0x8   : > { %p188_p2 = scmp.eq.s32.totalorder %s2494_s27, 3  ;;  %p193_p3 = scmp.ne.s32.totalorder %s3911_s22, %s3907_s21 }
   0x9   : > { %s4689_s29 = smov (%p34_p0, %s32_s29), 0  ;;  %p194_p5 = scmp.eq.s32.totalorder %s2495_s28, 3 }
   0xa   : > { %p4010_p4 = por %p188_p2, %p187_p1  ;;  %s172_s8 = ssub.s32 %s3923_s25, %s4689_s29 }
   0xb   : > { %p2496_p6 = scmp.ge.s32.totalorder %s3927_s26, 1  ;;  %p175_p7 = scmp.eq.s32.totalorder %s172_s8, 0 }
   0xc   : > { %s4674_s7 = scalar_select %p4010_p4, 1, 0 }
   0xd   : > { %p4017_p8 = por %p194_p5, %p193_p3  ;;  %p201_p9 = scmp.lt.s32.totalorder %s3927_s26, 5 }
   0xe   : > { %s4023_s10 = scalar_select %p175_p7, %s3915_s23, %s177_s30  }
   0xf   : > { %s4675_s9 = scalar_select %p4017_p8, 1, 0 }
  0x10   : > { %p4025_p10 = pnand %p2496_p6, %p201_p9  ;;  %p4029_p11 = scmp.eq.s32.totalorder %s2494_s27, 0 }
  0x11   : > { %s3929_s13 = smov [#allocation3]   ;;  %s3817_s18 = scalar_lea.hbm %s4666_s3, 16384 }
  0x12   : > { %s4676_s11 = scalar_select %p4025_p10, 1, 0 }
  0x13   : > { %s4677_s12 = scalar_select %p4029_p11, 1, 0 }
  0x14   : > { %p3689_p12 = pneg %p4025_p10  ;;  %s219_s14 = sshll.u32 %s3929_s13, 4  ;;  %s220_s14 = int_to_ptr.vmem [resolvable:$true] %s219_s14 }
  0x15   : > { %p3818_p0 = scmp.ne.s32.totalorder %s4666_s3, %s3817_s18  ;;  %p3824_p5 = scmp.lt.u32.totalorder %s3817_s18, %s4666_s3 }
  0x16   : > { %p4037_p13 = pnand %p4029_p11, %p3689_p12 }
  0x18   : > { %p3819_p1 = pneg %p4037_p13 }
  0x1a   : > { %p3820_p2 = pnand %p3819_p1, %p3818_p0 }
  0x1c   : > { %p3821_p3 = pneg %p3820_p2 }
  0x1e   : > { %p3826_p6 = pnand %p3824_p5, %p3821_p3 }
  0x20   : > { %3829 = shalt.err (!%p3826_p6)
}
  0x21   : > { %s3830_s30 = scalar_lea.vmem %s220_s14, 16384  ;;  %p3838_p8 = scmp.lt.s32.totalorder %s220_s14, %s220_s14 }
  0x22   : > { %p3831_p7 = scmp.ne.s32.totalorder %s220_s14, %s3830_s30  ;;  %p3839_p4 = scmp.lt.s32.totalorder %s3830_s30, %s3830_s30 }
  0x24   : > { %p3833_p9 = pnand %p3831_p7, %p3819_p1  ;;  %p3840_p11 = por %p3839_p4, %p3838_p8 }
  0x26   : > { %p3834_p12 = pneg %p3833_p9 }
  0x28   : > { %p3841_p10 = pnand %p3840_p11, %p3834_p12 }
  0x2a   : > { %3844 = shalt.err (!%p3841_p10)
}
  0x2b   : > { %s3930_s8 = smov 128   ;;  %s3931_s13 = smov 8  }
  0x2c   : > { %3692 = dma.hbm_to_vmem [thread:$0]  (!%p4037_p13), %s4666_s3, 16384, %s220_s14, [#allocation4], %s3930_s8, %s3930_s8, %s3931_s13  }
  0x2d   : > { %p4679_p0 = scmp.ne.s32.totalorder %s4676_s11, 0 }
  0x2e   : > { %p4680_p2 = scmp.ne.s32.totalorder (!%p4679_p0), %s4677_s12, 0 }
  0x2f   : > { %254 = sbr.rel (%p4679_p0) target bundleno = 2319 (0x90f), region = 44 }
  0x36   : > { %3898 = dma.done.wait (%p4680_p2), [#allocation4], 16384  }
  0x37   : > { %3900 = vsyncadd (%p4680_p2), [#allocation4], 4294950912  ;;  %s2503_s18 = sshll.u32 %s3919_s24, 4  ;;  %vm376_vm0 = vcmask 1043456   ;;  %vm327_vm1 = vcmask 31744   ;;  %v541_v6 = vld [vmem:[#allocation3] sm:$0xff] }
  0x38   : > { %p289_p4 = scmp.lt.s32.totalorder %s2503_s18, 63  ;;  %v319_v0 = vld [vmem:[%s4664_s1] sm:$0xf]  ;;  %v542_v7 = vld [vmem:[#allocation3 + $0x8] sm:$0xff]  ;;  %v543_v8 = vld [vmem:[#allocation3 + $0x10] sm:$0xff]  ;;  %p4681_p10 = scmp.ne.s32.totalorder %s4674_s7, 0 }
  0x39   : > { %2849 = vmatprep.subr.msk.mxu0 %vm376_vm0, %v319_v0  ;;  %v544_v9 = vld [vmem:[#allocation3 + $0x18] sm:$0xff]  ;;  %v3379_v10 = vpack.c.bf16 %v542_v7, %v541_v6  ;;  %v545_v13 = vld [vmem:[#allocation3 + $0x20] sm:$0xff]  ;;  %v546_v14 = vld [vmem:[#allocation3 + $0x28] sm:$0xff]  ;;  %s3932_s8 = smov [#allocation6]  }
  0x3a   : > { %s4691_s18 = smov (!%p289_p4, %s2503_s18), 63  ;;  %2850 = vmatpush3.msk.msra.mxu0 %vm376_vm0, %v319_v0  ;;  %v3383_v11 = vpack.c.bf16 %v544_v9, %v543_v8  ;;  %v3387_v16 = vpack.c.bf16 %v546_v14, %v545_v13  ;;  %v547_v18 = vld [vmem:[#allocation3 + $0x30] sm:$0xff]  ;;  %v548_v19 = vld [vmem:[#allocation3 + $0x38] sm:$0xff]  ;;  %v549_v23 = vld [vmem:[#allocation3 + $0x40] sm:$0xff]  ;;  %s3849_s13 = sshll.u32 %s3932_s8, 4  ;;  %s3850_s13 = int_to_ptr.vmem [resolvable:$false] %s3849_s13 }
  0x3b   : > { %s2504_s19 = sshll.u32 %s4691_s18, 3  ;;  %3380 = vmatprep.subr.bf16.mxu1 %v3379_v10  ;;  %v3391_v21 = vpack.c.bf16 %v548_v19, %v547_v18  ;;  %v550_v24 = vld [vmem:[#allocation3 + $0x48] sm:$0xff]  ;;  %v551_v28 = vld [vmem:[#allocation3 + $0x50] sm:$0xff]  ;;  %v552_v29 = vld [vmem:[#allocation3 + $0x58] sm:$0xff]  ;;  %s3851_s16 = scalar_lea.vmem %s3850_s13, 4096 }
  0x3c   : > { %s4067_s14 = scalar_lea.vmem %s4663_s0, %s2504_s19  ;;  %3382 = vmatpush3.bf16.msra.mxu1 %v3379_v10  ;;  %v3395_v26 = vpack.c.bf16 %v550_v24, %v549_v23  ;;  %v3399_v31 = vpack.c.bf16 %v552_v29, %v551_v28  ;;  %v553_v33 = vld [vmem:[#allocation3 + $0x60] sm:$0xff]  ;;  %v554_v34 = vld [vmem:[#allocation3 + $0x68] sm:$0xff]  ;;  %v555_v38 = vld [vmem:[#allocation3 + $0x70] sm:$0xff]  ;;  %s285_s19 = sand.u32 1, %s3911_s22  }
  0x3d   : > { %v303_v1 = vld [vmem:[%s4067_s14] sm:$0xff]  ;;  %v304_v2 = vld [vmem:[%s4067_s14 + $0x8] sm:$0xff]  ;;  %v305_v3 = vld [vmem:[%s4067_s14 + $0x10] sm:$0xff]  ;;  %3384 = vmatprep.subr.bf16.mxu1 %v3383_v11  ;;  %v3403_v36 = vpack.c.bf16 %v554_v34, %v553_v33  ;;  %s2502_s15 = sshll.u32 %s285_s19, 7  ;;  %s4617_s30 = scalar_lea.sflag [#allocation5], %s285_s19 }
  0x3e   : > { %2851 = vmatprep.mubr.msk.f32.mxu0 %vm327_vm1, %v303_v1  ;;  %v306_v4 = vld [vmem:[%s4067_s14 + $0x18] sm:$0xff]  ;;  %v307_v5 = vld [vmem:[%s4067_s14 + $0x20] sm:$0xff]  ;;  %v308_v12 = vld [vmem:[%s4067_s14 + $0x28] sm:$0xff]  ;;  %s4588_s20 = scalar_lea.vmem [#allocation6], %s2502_s15 }
  0x3f   : > { %2852 = vmatmul.mubr.msk.f32.vlgmr.msra.gmra.mrb[0].mxu0 %vm327_vm1, %v304_v2  ;;  %v309_v15 = vld [vmem:[%s4067_s14 + $0x30] sm:$0xff]  ;;  %v310_v17 = vld [vmem:[%s4067_s14 + $0x38] sm:$0xff]  ;;  %v311_v20 = vld [vmem:[%s4067_s14 + $0x40] sm:$0xff]  ;;  %s2395_s11 = sshll.u32 %s4588_s20, 4  ;;  %s4611_s11 = int_to_ptr.vmem [resolvable:$true] %s2395_s11 }
  0x40   : > { %2854 = vmatprep.mubr.msk.f32.mxu0 %vm327_vm1, %v305_v3  ;;  %3386 = vmatpush3.bf16.msra.mxu1 %v3383_v11  ;;  %v312_v22 = vld [vmem:[%s4067_s14 + $0x48] sm:$0xff]  ;;  %v313_v25 = vld [vmem:[%s4067_s14 + $0x50] sm:$0xff]  ;;  %v314_v27 = vld [vmem:[%s4067_s14 + $0x58] sm:$0xff]  ;;  %p3852_p1 = scmp.lt.s32.totalorder %s4611_s11, %s3850_s13 }
  0x41   : > { %3388 = vmatprep.subr.bf16.mxu1 %v3387_v16  ;;  %v315_v30 = vld [vmem:[%s4067_s14 + $0x60] sm:$0xff]  ;;  %v316_v32 = vld [vmem:[%s4067_s14 + $0x68] sm:$0xff]  ;;  %v317_v35 = vld [vmem:[%s4067_s14 + $0x70] sm:$0xff] }
  0x42   : > { %v318_v37 = vld [vmem:[%s4067_s14 + $0x78] sm:$0xff]  ;;  %v559_v41 = vld [vmem:[#allocation3 + $0x80] sm:$0xff]  ;;  %v560_v42 = vld [vmem:[#allocation3 + $0x88] sm:$0xff]  ;;  %s2543_s14 = sshll.u32 %s3919_s24, 11  ;;  %s3845_s24 = scalar_lea.vmem %s4611_s11, 2048 }
  0x43   : > { %2855 = vmatmul.mubr.msk.f32.gmra.mrb[2].mxu0 %vm327_vm1, %v306_v4  ;;  %v556_v39 = vld [vmem:[#allocation3 + $0x78] sm:$0xff]  ;;  %v561_v43 = vld [vmem:[#allocation3 + $0x90] sm:$0xff]  ;;  %v3411_v44 = vpack.c.bf16 %v560_v42, %v559_v41  ;;  %v563_v47 = vld [vmem:[#allocation3 + $0xa0] sm:$0xff]  ;;  %s4609_s28 = scalar_lea.hbm %s4669_s6, %s2543_s14  ;;  %p3846_p8 = scmp.ne.s32.totalorder %s4611_s11, %s3845_s24 }
  0x44   : > { %2857 = vmatprep.mubr.msk.f32.mxu0 %vm327_vm1, %v307_v5  ;;  %3390 = vmatpush3.bf16.msra.mxu1 %v3387_v16  ;;  %v3407_v40 = vpack.c.bf16 %v556_v39, %v555_v38  ;;  %v562_v45 = vld [vmem:[#allocation3 + $0x98] sm:$0xff]  ;;  %v564_v48 = vld [vmem:[#allocation3 + $0xa8] sm:$0xff]  ;;  %v565_v50 = vld [vmem:[#allocation3 + $0xb0] sm:$0xff]  ;;  %p3853_p3 = scmp.lt.s32.totalorder %s3851_s16, %s3845_s24 }
  0x45   : > { %3392 = vmatprep.subr.bf16.mxu1 %v3391_v21  ;;  %v3415_v46 = vpack.c.bf16 %v562_v45, %v561_v43  ;;  %3412 = vmatprep.subr.bf16.mxu0 %v3411_v44  ;;  %v3419_v49 = vpack.c.bf16 %v564_v48, %v563_v47  ;;  %v566_v51 = vld [vmem:[#allocation3 + $0xb8] sm:$0xff]  ;;  %v567_v53 = vld [vmem:[#allocation3 + $0xc0] sm:$0xff]  ;;  %v568_v54 = vld [vmem:[#allocation3 + $0xc8] sm:$0xff]  ;;  %p3847_p11 = pnand %p3846_p8, %p4681_p10 }
  0x46   : > { %3414 = vmatpush3.bf16.msra.mxu0 %v3411_v44  ;;  %v3423_v52 = vpack.c.bf16 %v566_v51, %v565_v50  ;;  %v3427_v55 = vpack.c.bf16 %v568_v54, %v567_v53  ;;  %v569_v56 = vld [vmem:[#allocation3 + $0xd0] sm:$0xff]  ;;  %v570_v57 = vld [vmem:[#allocation3 + $0xd8] sm:$0xff]  ;;  %v571_v59 = vld [vmem:[#allocation3 + $0xe0] sm:$0xff]  ;;  %p3854_p5 = por %p3853_p3, %p3852_p1 }
  0x47   : > { %2858 = vmatmul.mubr.msk.f32.gmra.mrb[4].mxu0 %vm327_vm1, %v308_v12  ;;  %3416 = vmatprep.subr.bf16.mxu0 %v3415_v46  ;;  %v3431_v58 = vpack.c.bf16 %v570_v57, %v569_v56  ;;  %v572_v60 = vld [vmem:[#allocation3 + $0xe8] sm:$0xff]  ;;  %v2505_v62 = vld [vmem:[%s4665_s2] ss:$0 sm:$0xff]  ;;  %v573_v47 = vld [vmem:[#allocation3 + $0xf0] sm:$0xff]  ;;  %p3848_p13 = pneg %p3847_p11 }
  0x48   : > { %2860 = vmatprep.mubr.msk.f32.mxu0 %vm327_vm1, %v309_v15  ;;  %3394 = vmatpush3.bf16.msra.mxu1 %v3391_v21  ;;  %v3435_v61 = vpack.c.bf16 %v572_v60, %v571_v59  ;;  %v574_v48 = vld [vmem:[#allocation3 + $0xf8] sm:$0xff]  ;;  %v928_v50 = vld [vmem:[#allocation3 + $0x100] sm:$0xff]  ;;  %v929_v51 = vld [vmem:[#allocation3 + $0x108] sm:$0xff] }
  0x49   : > { %3396 = vmatprep.subr.bf16.mxu1 %v3395_v26  ;;  %v3443_v53 = vpack.c.bf16 %v929_v51, %v928_v50  ;;  %v931_v54 = vld [vmem:[#allocation3 + $0x118] sm:$0xff]  ;;  %v932_v56 = vld [vmem:[#allocation3 + $0x120] sm:$0xff]  ;;  %v933_v57 = vld [vmem:[#allocation3 + $0x128] sm:$0xff]  ;;  %p3855_p6 = pnand %p3854_p5, %p3848_p13 }
  0x4a   : > { %3418 = vmatpush3.bf16.msra.mxu0 %v3415_v46  ;;  %v934_v59 = vld [vmem:[#allocation3 + $0x130] sm:$0xff]  ;;  %v935_v60 = vld [vmem:[#allocation3 + $0x138] sm:$0xff] }
  0x4b   : > { %2861 = vmatmul.mubr.msk.f32.gmra.mrb[6].mxu0 %vm327_vm1, %v310_v17  ;;  %3420 = vmatprep.subr.bf16.mxu0 %v3419_v49 }
  0x4c   : > { %2863 = vmatprep.mubr.msk.f32.mxu0 %vm327_vm1, %v311_v20  ;;  %3398 = vmatpush3.bf16.msra.mxu1 %v3395_v26 }
  0x4d   : > { %3400 = vmatprep.subr.bf16.mxu1 %v3399_v31 }
  0x4e   : > { %3422 = vmatpush3.bf16.msra.mxu0 %v3419_v49  ;;  %v3439_v49 = vpack.c.bf16 %v574_v48, %v573_v47 }
  0x4f   : > { %2864 = vmatmul.mubr.msk.f32.gmra.mrb[8].mxu0 %vm327_vm1, %v312_v22  ;;  %3424 = vmatprep.subr.bf16.mxu0 %v3423_v52 }
  0x50   : > { %2866 = vmatprep.mubr.msk.f32.mxu0 %vm327_vm1, %v313_v25  ;;  %3402 = vmatpush3.bf16.msra.mxu1 %v3399_v31 }
  0x51   : > { %3404 = vmatprep.subr.bf16.mxu1 %v3403_v36 }
  0x52   : > { %3426 = vmatpush3.bf16.msra.mxu0 %v3423_v52  ;;  %v930_v52 = vld [vmem:[#allocation3 + $0x110] sm:$0xff] }
  0x53   : > { %2867 = vmatmul.mubr.msk.f32.gmra.mrb[10].mxu0 %vm327_vm1, %v314_v27  ;;  %3428 = vmatprep.subr.bf16.mxu0 %v3427_v55 }
  0x54   : > { %2869 = vmatprep.mubr.msk.f32.mxu0 %vm327_vm1, %v315_v30  ;;  %3406 = vmatpush3.bf16.msra.mxu1 %v3403_v36 }
  0x55   : > { %3408 = vmatprep.subr.bf16.mxu1 %v3407_v40 }
  0x56   : > { %3430 = vmatpush3.bf16.msra.mxu0 %v3427_v55  ;;  %v3447_v55 = vpack.c.bf16 %v931_v54, %v930_v52 }
  0x57   : > { %2870 = vmatmul.mubr.msk.f32.gmra.mrb[12].mxu0 %vm327_vm1, %v316_v32  ;;  %3432 = vmatprep.subr.bf16.mxu0 %v3431_v58 }
  0x58   : > { %2872 = vmatprep.mubr.msk.f32.mxu0 %vm327_vm1, %v317_v35  ;;  %3410 = vmatpush3.bf16.msra.mxu1 %v3407_v40 }
  0x59   : > { %3444 = vmatprep.subr.bf16.mxu1 %v3443_v53 }
  0x5a   : > { %3434 = vmatpush3.bf16.msra.mxu0 %v3431_v58  ;;  %v3451_v58 = vpack.c.bf16 %v933_v57, %v932_v56 }
  0x5b   : > { %2873 = vmatmul.mubr.msk.f32.gmra.mrb[14].mxu0 %vm327_vm1, %v318_v37  ;;  %3436 = vmatprep.subr.bf16.mxu0 %v3435_v61 }
  0x5e   : > { %3438 = vmatpush3.bf16.msra.mxu0 %v3435_v61  ;;  %v3455_v61 = vpack.c.bf16 %v935_v60, %v934_v59 }
  0x5f   : > { %3440 = vmatprep.subr.bf16.mxu0 %v3439_v49 }
  0x62   : > { %3442 = vmatpush3.bf16.msra.mxu0 %v3439_v49 }
 0x112   : > { %v2853_v63 = vpop.f32.mrb[0].mxu0 }
 0x113   : > { %v4107_v0 = vadd.f32 %v2853_v63, %v2505_v62  ;;  %v446_v1 = vpop.f32.mrb[1].mxu0  ;;  %v937_v63 = vld [vmem:[#allocation3 + $0x148] sm:$0xff] }
 0x114   : > { %v4109_v2 = vadd.f32 %v2505_v62, %v446_v1 }
 0x115   : > { %v526_v5 = vmax.f32 %v4107_v0, 0.0 }
 0x116   : > { %v525_v3 = vmax.f32 %v4109_v2, 0.0  ;;  %v2856_v4 = vpop.f32.mrb[2].mxu0 }
 0x117   : > { %v4113_v6 = vadd.f32 %v2856_v4, %v2505_v62  ;;  %v456_v7 = vpop.f32.mrb[3].mxu0  ;;  %v938_v4 = vld [vmem:[#allocation3 + $0x150] sm:$0xff] }
 0x118   : > { %v4115_v8 = vadd.f32 %v2505_v62, %v456_v7  ;;  %2907 = vmatprep.mubr.f32.mxu1 %v525_v3  ;;  %v939_v7 = vld [vmem:[#allocation3 + $0x158] sm:$0xff] }
 0x119   : > { %2908 = vmatmul.mubr.f32.vlgmr.msra.gmra.mrb[0].mxu1 %v526_v5  ;;  %v528_v11 = vmax.f32 %v4113_v6, 0.0 }
 0x11a   : > { %v527_v9 = vmax.f32 %v4115_v8, 0.0  ;;  %v2859_v10 = vpop.f32.mrb[4].mxu0  ;;  %3446 = vmatpush3.bf16.msra.mxu1 %v3443_v53 }
 0x11b   : > { %v4123_v12 = vadd.f32 %v2859_v10, %v2505_v62  ;;  %v466_v13 = vpop.f32.mrb[5].mxu0  ;;  %3448 = vmatprep.subr.bf16.mxu1 %v3447_v55  ;;  %v3463_v10 = vpack.c.bf16 %v939_v7, %v938_v4 }
 0x11c   : > { %v4125_v14 = vadd.f32 %v2505_v62, %v466_v13  ;;  %2910 = vmatprep.mubr.f32.mxu1 %v527_v9  ;;  %v2524_v13 = vld [vmem:[%s4667_s4] ss:$0 sm:$0xff] }
 0x11d   : > { %2911 = vmatmul.mubr.f32.gmra.mrb[2].mxu1 %v528_v11  ;;  %v530_v17 = vmax.f32 %v4123_v12, 0.0 }
 0x11e   : > { %v529_v15 = vmax.f32 %v4125_v14, 0.0  ;;  %v2862_v16 = vpop.f32.mrb[6].mxu0  ;;  %3450 = vmatpush3.bf16.msra.mxu1 %v3447_v55 }
 0x11f   : > { %v4133_v18 = vadd.f32 %v2862_v16, %v2505_v62  ;;  %v476_v19 = vpop.f32.mrb[7].mxu0  ;;  %3452 = vmatprep.subr.bf16.mxu1 %v3451_v58 }
 0x120   : > { %v4135_v20 = vadd.f32 %v2505_v62, %v476_v19  ;;  %2913 = vmatprep.mubr.f32.mxu1 %v529_v15 }
 0x121   : > { %2914 = vmatmul.mubr.f32.gmra.mrb[4].mxu1 %v530_v17  ;;  %v532_v23 = vmax.f32 %v4133_v18, 0.0 }
 0x122   : > { %v531_v21 = vmax.f32 %v4135_v20, 0.0  ;;  %v2865_v22 = vpop.f32.mrb[8].mxu0  ;;  %3454 = vmatpush3.bf16.msra.mxu1 %v3451_v58 }
 0x123   : > { %v4143_v24 = vadd.f32 %v2865_v22, %v2505_v62  ;;  %v486_v25 = vpop.f32.mrb[9].mxu0  ;;  %3456 = vmatprep.subr.bf16.mxu1 %v3455_v61 }
 0x124   : > { %v4145_v26 = vadd.f32 %v2505_v62, %v486_v25  ;;  %2916 = vmatprep.mubr.f32.mxu1 %v531_v21 }
 0x125   : > { %2917 = vmatmul.mubr.f32.gmra.mrb[6].mxu1 %v532_v23  ;;  %v534_v29 = vmax.f32 %v4143_v24, 0.0 }
 0x126   : > { %v533_v27 = vmax.f32 %v4145_v26, 0.0  ;;  %v2868_v28 = vpop.f32.mrb[10].mxu0  ;;  %3458 = vmatpush3.bf16.msra.mxu1 %v3455_v61 }
 0x127   : > { %v4153_v30 = vadd.f32 %v2868_v28, %v2505_v62  ;;  %v496_v31 = vpop.f32.mrb[11].mxu0 }
 0x128   : > { %v4155_v32 = vadd.f32 %v2505_v62, %v496_v31  ;;  %2919 = vmatprep.mubr.f32.mxu1 %v533_v27 }
 0x129   : > { %2920 = vmatmul.mubr.f32.gmra.mrb[8].mxu1 %v534_v29  ;;  %v536_v35 = vmax.f32 %v4153_v30, 0.0 }
 0x12a   : > { %v535_v33 = vmax.f32 %v4155_v32, 0.0  ;;  %v2871_v34 = vpop.f32.mrb[12].mxu0 }
 0x12b   : > { %v4163_v36 = vadd.f32 %v2871_v34, %v2505_v62  ;;  %v506_v37 = vpop.f32.mrb[13].mxu0 }
 0x12c   : > { %v4165_v38 = vadd.f32 %v2505_v62, %v506_v37  ;;  %2922 = vmatprep.mubr.f32.mxu1 %v535_v33 }
 0x12d   : > { %2923 = vmatmul.mubr.f32.gmra.mrb[10].mxu1 %v536_v35  ;;  %v538_v41 = vmax.f32 %v4163_v36, 0.0  ;;  %v961_v36 = vld [vmem:[#allocation3 + $0x1f0] sm:$0xff] }
 0x12e   : > { %v537_v39 = vmax.f32 %v4165_v38, 0.0  ;;  %v2874_v40 = vpop.f32.mrb[14].mxu0 }
 0x12f   : > { %v4173_v42 = vadd.f32 %v2874_v40, %v2505_v62  ;;  %v516_v43 = vpop.f32.mrb[15].mxu0 }
 0x130   : > { %v4175_v44 = vadd.f32 %v2505_v62, %v516_v43  ;;  %2925 = vmatprep.mubr.f32.mxu1 %v537_v39  ;;  %v936_v62 = vld [vmem:[#allocation3 + $0x140] sm:$0xff] }
 0x131   : > { %2926 = vmatmul.mubr.f32.gmra.mrb[12].mxu1 %v538_v41  ;;  %v540_v46 = vmax.f32 %v4173_v42, 0.0  ;;  %v3459_v1 = vpack.c.bf16 %v937_v63, %v936_v62 }
 0x132   : > { %v539_v45 = vmax.f32 %v4175_v44, 0.0  ;;  %v1319_v44 = vld [vmem:[#allocation3 + $0x218] sm:$0xff] }
 0x133   : > { %3460 = vmatprep.subr.bf16.mxu1 %v3459_v1 }
 0x134   : > { %2928 = vmatprep.mubr.f32.mxu1 %v539_v45  ;;  %3462 = vmatpush3.bf16.msra.mxu1 %v3459_v1 }
 0x135   : > { %2929 = vmatmul.mubr.f32.gmra.mrb[14].mxu1 %v540_v46  ;;  %3464 = vmatprep.subr.bf16.mxu1 %v3463_v10 }
 0x138   : > { %3466 = vmatpush3.bf16.msra.mxu1 %v3463_v10 }
 0x1ec   : > { %v2909_v16 = vpop.f32.mrb[0].mxu1 }
 0x1ed   : > { %v655_v19 = vadd.f32 %v2909_v16, %v2524_v13  ;;  %v649_v22 = vpop.f32.mrb[1].mxu1 }
 0x1ee   : > { %v650_v25 = vadd.f32 %v2524_v13, %v649_v22 }
 0x1ef   : > { %v729_v34 = vmax.f32 %v655_v19, 0.0 }
 0x1f0   : > { %v728_v28 = vmax.f32 %v650_v25, 0.0  ;;  %v2912_v31 = vpop.f32.mrb[2].mxu1 }
 0x1f1   : > { %v665_v37 = vadd.f32 %v2912_v31, %v2524_v13  ;;  %v659_v40 = vpop.f32.mrb[3].mxu1 }
 0x1f2   : > { %v660_v43 = vadd.f32 %v2524_v13, %v659_v40  ;;  %2963 = vmatprep.mubr.f32.mxu0 %v728_v28 }
 0x1f3   : > { %2964 = vmatmul.mubr.f32.vlgmr.msra.gmra.mrb[16].mxu0 %v729_v34  ;;  %v731_v49 = vmax.f32 %v665_v37, 0.0 }
 0x1f4   : > { %v730_v47 = vmax.f32 %v660_v43, 0.0  ;;  %v2915_v48 = vpop.f32.mrb[4].mxu1 }
 0x1f5   : > { %v675_v50 = vadd.f32 %v2915_v48, %v2524_v13  ;;  %v669_v51 = vpop.f32.mrb[5].mxu1 }
 0x1f6   : > { %v670_v52 = vadd.f32 %v2524_v13, %v669_v51  ;;  %2966 = vmatprep.mubr.f32.mxu0 %v730_v47 }
 0x1f7   : > { %2967 = vmatmul.mubr.f32.gmra.mrb[18].mxu0 %v731_v49  ;;  %v733_v55 = vmax.f32 %v675_v50, 0.0 }
 0x1f8   : > { %v732_v53 = vmax.f32 %v670_v52, 0.0  ;;  %v2918_v54 = vpop.f32.mrb[6].mxu1 }
 0x1f9   : > { %v685_v56 = vadd.f32 %v2918_v54, %v2524_v13  ;;  %v679_v57 = vpop.f32.mrb[7].mxu1  ;;  %v940_v54 = vld [vmem:[#allocation3 + $0x160] sm:$0xff] }
 0x1fa   : > { %v680_v58 = vadd.f32 %v2524_v13, %v679_v57  ;;  %2969 = vmatprep.mubr.f32.mxu0 %v732_v53  ;;  %v942_v57 = vld [vmem:[#allocation3 + $0x170] sm:$0xff] }
 0x1fb   : > { %2970 = vmatmul.mubr.f32.gmra.mrb[20].mxu0 %v733_v55  ;;  %v735_v61 = vmax.f32 %v685_v56, 0.0  ;;  %v941_v55 = vld [vmem:[#allocation3 + $0x168] sm:$0xff] }
 0x1fc   : > { %v734_v59 = vmax.f32 %v680_v58, 0.0  ;;  %v2921_v60 = vpop.f32.mrb[8].mxu1  ;;  %v3467_v56 = vpack.c.bf16 %v941_v55, %v940_v54  ;;  %v943_v58 = vld [vmem:[#allocation3 + $0x178] sm:$0xff] }
 0x1fd   : > { %v695_v62 = vadd.f32 %v2921_v60, %v2524_v13  ;;  %v689_v63 = vpop.f32.mrb[9].mxu1  ;;  %v947_v60 = vld [vmem:[#allocation3 + $0x180] sm:$0xff] }
 0x1fe   : > { %v690_v1 = vadd.f32 %v2524_v13, %v689_v63  ;;  %2972 = vmatprep.mubr.f32.mxu0 %v734_v59  ;;  %3468 = vmatprep.subr.bf16.mxu1 %v3467_v56  ;;  %v3471_v59 = vpack.c.bf16 %v943_v58, %v942_v57  ;;  %v950_v63 = vld [vmem:[#allocation3 + $0x198] sm:$0xff] }
 0x1ff   : > { %2973 = vmatmul.mubr.f32.gmra.mrb[22].mxu0 %v735_v61  ;;  %v737_v10 = vmax.f32 %v695_v62, 0.0  ;;  %3470 = vmatpush3.bf16.msra.mxu1 %v3467_v56  ;;  %v948_v61 = vld [vmem:[#allocation3 + $0x188] sm:$0xff]  ;;  %v949_v62 = vld [vmem:[#allocation3 + $0x190] sm:$0xff] }
 0x200   : > { %v736_v4 = vmax.f32 %v690_v1, 0.0  ;;  %v2924_v7 = vpop.f32.mrb[10].mxu1  ;;  %3472 = vmatprep.subr.bf16.mxu1 %v3471_v59  ;;  %v3479_v1 = vpack.c.bf16 %v950_v63, %v949_v62 }
 0x201   : > { %v705_v16 = vadd.f32 %v2924_v7, %v2524_v13  ;;  %v699_v19 = vpop.f32.mrb[11].mxu1  ;;  %v952_v7 = vld [vmem:[#allocation3 + $0x1a8] sm:$0xff] }
 0x202   : > { %v700_v22 = vadd.f32 %v2524_v13, %v699_v19  ;;  %2975 = vmatprep.mubr.f32.mxu0 %v736_v4  ;;  %v951_v4 = vld [vmem:[#allocation3 + $0x1a0] sm:$0xff]  ;;  %v954_v19 = vld [vmem:[#allocation3 + $0x1b8] sm:$0xff] }
 0x203   : > { %2976 = vmatmul.mubr.f32.gmra.mrb[24].mxu0 %v737_v10  ;;  %v739_v31 = vmax.f32 %v705_v16, 0.0  ;;  %3474 = vmatpush3.bf16.msra.mxu1 %v3471_v59  ;;  %v3483_v10 = vpack.c.bf16 %v952_v7, %v951_v4  ;;  %v953_v16 = vld [vmem:[#allocation3 + $0x1b0] sm:$0xff] }
 0x204   : > { %v738_v25 = vmax.f32 %v700_v22, 0.0  ;;  %v2927_v28 = vpop.f32.mrb[12].mxu1  ;;  %v3487_v22 = vpack.c.bf16 %v954_v19, %v953_v16 }
 0x205   : > { %v715_v34 = vadd.f32 %v2927_v28, %v2524_v13  ;;  %v709_v37 = vpop.f32.mrb[13].mxu1  ;;  %v956_v28 = vld [vmem:[#allocation3 + $0x1c8] sm:$0xff] }
 0x206   : > { %v710_v40 = vadd.f32 %v2524_v13, %v709_v37  ;;  %2978 = vmatprep.mubr.f32.mxu0 %v738_v25  ;;  %v955_v25 = vld [vmem:[#allocation3 + $0x1c0] sm:$0xff]  ;;  %v958_v37 = vld [vmem:[#allocation3 + $0x1d8] sm:$0xff] }
 0x207   : > { %2979 = vmatmul.mubr.f32.gmra.mrb[26].mxu0 %v739_v31  ;;  %v741_v48 = vmax.f32 %v715_v34, 0.0  ;;  %v3491_v31 = vpack.c.bf16 %v956_v28, %v955_v25  ;;  %v957_v34 = vld [vmem:[#allocation3 + $0x1d0] sm:$0xff] }
 0x208   : > { %v740_v43 = vmax.f32 %v710_v40, 0.0  ;;  %v2930_v47 = vpop.f32.mrb[14].mxu1  ;;  %v3495_v40 = vpack.c.bf16 %v958_v37, %v957_v34 }
 0x209   : > { %v725_v49 = vadd.f32 %v2930_v47, %v2524_v13  ;;  %v719_v50 = vpop.f32.mrb[15].mxu1  ;;  %v960_v47 = vld [vmem:[#allocation3 + $0x1e8] sm:$0xff] }
 0x20a   : > { %v720_v51 = vadd.f32 %v2524_v13, %v719_v50  ;;  %2981 = vmatprep.mubr.f32.mxu0 %v740_v43  ;;  %v3475_v13 = vpack.c.bf16 %v948_v61, %v947_v60  ;;  %v959_v43 = vld [vmem:[#allocation3 + $0x1e0] sm:$0xff] }
 0x20b   : > { %2982 = vmatmul.mubr.f32.gmra.mrb[28].mxu0 %v741_v48  ;;  %v743_v53 = vmax.f32 %v725_v49, 0.0  ;;  %v3499_v48 = vpack.c.bf16 %v960_v47, %v959_v43  ;;  %v4193_v49 = vld [vmem:[%s4667_s4 + $0x1] ss:$0 sm:$0xff] }
 0x20c   : > { %v742_v52 = vmax.f32 %v720_v51, 0.0  ;;  %3476 = vmatprep.subr.bf16.mxu0 %v3475_v13 }
 0x20d   : > { %3478 = vmatpush3.bf16.msra.mxu0 %v3475_v13 }
 0x20e   : > { %2984 = vmatprep.mubr.f32.mxu0 %v742_v52  ;;  %3480 = vmatprep.subr.bf16.mxu0 %v3479_v1 }
 0x20f   : > { %2985 = vmatmul.mubr.f32.gmra.mrb[30].mxu0 %v743_v53 }
 0x211   : > { %3482 = vmatpush3.bf16.msra.mxu0 %v3479_v1 }
 0x212   : > { %3484 = vmatprep.subr.bf16.mxu0 %v3483_v10 }
 0x215   : > { %3486 = vmatpush3.bf16.msra.mxu0 %v3483_v10 }
 0x216   : > { %3488 = vmatprep.subr.bf16.mxu0 %v3487_v22 }
 0x219   : > { %3490 = vmatpush3.bf16.msra.mxu0 %v3487_v22 }
 0x21a   : > { %3492 = vmatprep.subr.bf16.mxu0 %v3491_v31 }
 0x21d   : > { %3494 = vmatpush3.bf16.msra.mxu0 %v3491_v31 }
 0x21e   : > { %3496 = vmatprep.subr.bf16.mxu0 %v3495_v40 }
 0x221   : > { %3498 = vmatpush3.bf16.msra.mxu0 %v3495_v40 }
 0x222   : > { %3500 = vmatprep.subr.bf16.mxu0 %v3499_v48 }
 0x225   : > { %3502 = vmatpush3.bf16.msra.mxu0 %v3499_v48 }
 0x2c6   : > { %v2965_v50 = vpop.f32.mrb[16].mxu0 }
 0x2c7   : > { %v822_v51 = vadd.f32 %v2965_v50, %v4193_v49  ;;  %v816_v52 = vpop.f32.mrb[17].mxu0 }
 0x2c8   : > { %v817_v53 = vadd.f32 %v4193_v49, %v816_v52 }
 0x2c9   : > { %v896_v54 = vmax.f32 %v822_v51, 0.0 }
 0x2ca   : > { %v895_v55 = vmax.f32 %v817_v53, 0.0  ;;  %v2968_v56 = vpop.f32.mrb[18].mxu0 }
 0x2cb   : > { %v832_v57 = vadd.f32 %v2968_v56, %v4193_v49  ;;  %v826_v58 = vpop.f32.mrb[19].mxu0  ;;  %v4205_v61 = vadd.f32 %v896_v54, %v526_v5 }
 0x2cc   : > { %v4200_v59 = vadd.f32 %v895_v55, %v525_v3  ;;  %v827_v60 = vadd.f32 %v4193_v49, %v826_v58  ;;  %v1317_v58 = vld [vmem:[#allocation3 + $0x208] sm:$0xff] }
 0x2cd   : > { %v898_v62 = vmax.f32 %v832_v57, 0.0 }
 0x2ce   : > { %v897_v13 = vmax.f32 %v827_v60, 0.0  ;;  %v2971_v63 = vpop.f32.mrb[20].mxu0  ;;  %3019 = vmatprep.mubr.f32.mxu1 %v4200_v59  ;;  %v1318_v60 = vld [vmem:[#allocation3 + $0x210] sm:$0xff] }
 0x2cf   : > { %v842_v1 = vadd.f32 %v2971_v63, %v4193_v49  ;;  %v836_v4 = vpop.f32.mrb[21].mxu0  ;;  %3020 = vmatmul.mubr.f32.vlgmr.msra.gmra.mrb[16].mxu1 %v4205_v61  ;;  %v4217_v0 = vadd.f32 %v898_v62, %v528_v11  ;;  %v1321_v63 = vld [vmem:[#allocation3 + $0x228] sm:$0xff] }
 0x2d0   : > { %v4212_v2 = vadd.f32 %v897_v13, %v527_v9  ;;  %v837_v3 = vadd.f32 %v4193_v49, %v836_v4  ;;  %v1320_v13 = vld [vmem:[#allocation3 + $0x220] sm:$0xff] }
 0x2d1   : > { %v900_v5 = vmax.f32 %v842_v1, 0.0  ;;  %v3515_v42 = vpack.c.bf16 %v1321_v63, %v1320_v13  ;;  %v1323_v1 = vld [vmem:[#allocation3 + $0x238] sm:$0xff] }
 0x2d2   : > { %v899_v7 = vmax.f32 %v837_v3, 0.0  ;;  %v2974_v10 = vpop.f32.mrb[22].mxu0  ;;  %3022 = vmatprep.mubr.f32.mxu1 %v4212_v2  ;;  %v1324_v3 = vld [vmem:[#allocation3 + $0x240] sm:$0xff] }
 0x2d3   : > { %v852_v16 = vadd.f32 %v2974_v10, %v4193_v49  ;;  %v846_v19 = vpop.f32.mrb[23].mxu0  ;;  %3023 = vmatmul.mubr.f32.gmra.mrb[18].mxu1 %v4217_v0  ;;  %v4229_v6 = vadd.f32 %v900_v5, %v530_v17  ;;  %v1325_v5 = vld [vmem:[#allocation3 + $0x248] sm:$0xff]  ;;  %v1326_v10 = vld [vmem:[#allocation3 + $0x250] sm:$0xff] }
 0x2d4   : > { %v4224_v8 = vadd.f32 %v899_v7, %v529_v15  ;;  %v847_v9 = vadd.f32 %v4193_v49, %v846_v19  ;;  %v3523_v7 = vpack.c.bf16 %v1325_v5, %v1324_v3 }
 0x2d5   : > { %v902_v11 = vmax.f32 %v852_v16, 0.0  ;;  %v1327_v16 = vld [vmem:[#allocation3 + $0x258] sm:$0xff] }
 0x2d6   : > { %v901_v22 = vmax.f32 %v847_v9, 0.0  ;;  %v2977_v25 = vpop.f32.mrb[24].mxu0  ;;  %3025 = vmatprep.mubr.f32.mxu1 %v4224_v8  ;;  %v3527_v19 = vpack.c.bf16 %v1327_v16, %v1326_v10  ;;  %v2528_v9 = vld [vmem:[%s4667_s4 + $0x2] ss:$0 sm:$0xff] }
 0x2d7   : > { %v862_v28 = vadd.f32 %v2977_v25, %v4193_v49  ;;  %v856_v31 = vpop.f32.mrb[25].mxu0  ;;  %3026 = vmatmul.mubr.f32.gmra.mrb[20].mxu1 %v4229_v6  ;;  %v4241_v12 = vadd.f32 %v902_v11, %v532_v23 }
 0x2d8   : > { %v4236_v14 = vadd.f32 %v901_v22, %v531_v21  ;;  %v857_v15 = vadd.f32 %v4193_v49, %v856_v31 }
 0x2d9   : > { %v904_v17 = vmax.f32 %v862_v28, 0.0 }
 0x2da   : > { %v903_v34 = vmax.f32 %v857_v15, 0.0  ;;  %v2980_v37 = vpop.f32.mrb[26].mxu0  ;;  %3028 = vmatprep.mubr.f32.mxu1 %v4236_v14 }
 0x2db   : > { %v872_v40 = vadd.f32 %v2980_v37, %v4193_v49  ;;  %v866_v43 = vpop.f32.mrb[27].mxu0  ;;  %3029 = vmatmul.mubr.f32.gmra.mrb[22].mxu1 %v4241_v12  ;;  %v4253_v18 = vadd.f32 %v904_v17, %v534_v29 }
 0x2dc   : > { %v4248_v20 = vadd.f32 %v903_v34, %v533_v27  ;;  %v867_v21 = vadd.f32 %v4193_v49, %v866_v43 }
 0x2dd   : > { %v906_v23 = vmax.f32 %v872_v40, 0.0 }
 0x2de   : > { %v905_v47 = vmax.f32 %v867_v21, 0.0  ;;  %v2983_v48 = vpop.f32.mrb[28].mxu0  ;;  %3031 = vmatprep.mubr.f32.mxu1 %v4248_v20 }
 0x2df   : > { %v882_v50 = vadd.f32 %v2983_v48, %v4193_v49  ;;  %v876_v51 = vpop.f32.mrb[29].mxu0  ;;  %3032 = vmatmul.mubr.f32.gmra.mrb[24].mxu1 %v4253_v18  ;;  %v4265_v24 = vadd.f32 %v906_v23, %v536_v35 }
 0x2e0   : > { %v4260_v26 = vadd.f32 %v905_v47, %v535_v33  ;;  %v877_v27 = vadd.f32 %v4193_v49, %v876_v51 }
 0x2e1   : > { %v908_v29 = vmax.f32 %v882_v50, 0.0 }
 0x2e2   : > { %v907_v52 = vmax.f32 %v877_v27, 0.0  ;;  %v2986_v53 = vpop.f32.mrb[30].mxu0  ;;  %3034 = vmatprep.mubr.f32.mxu1 %v4260_v26 }
 0x2e3   : > { %v892_v54 = vadd.f32 %v2986_v53, %v4193_v49  ;;  %v886_v55 = vpop.f32.mrb[31].mxu0  ;;  %3035 = vmatmul.mubr.f32.gmra.mrb[26].mxu1 %v4265_v24  ;;  %v4277_v30 = vadd.f32 %v908_v29, %v538_v41 }
 0x2e4   : > { %v4272_v32 = vadd.f32 %v907_v52, %v537_v39  ;;  %v887_v33 = vadd.f32 %v4193_v49, %v886_v55  ;;  %v962_v39 = vld [vmem:[#allocation3 + $0x1f8] sm:$0xff]  ;;  %v1316_v49 = vld [vmem:[#allocation3 + $0x200] sm:$0xff] }
 0x2e5   : > { %v910_v35 = vmax.f32 %v892_v54, 0.0  ;;  %v3503_v41 = vpack.c.bf16 %v962_v39, %v961_v36  ;;  %v3507_v62 = vpack.c.bf16 %v1317_v58, %v1316_v49 }
 0x2e6   : > { %v909_v56 = vmax.f32 %v887_v33, 0.0  ;;  %3037 = vmatprep.mubr.f32.mxu1 %v4272_v32 }
 0x2e7   : > { %3038 = vmatmul.mubr.f32.gmra.mrb[28].mxu1 %v4277_v30  ;;  %v4287_v38 = vadd.f32 %v910_v35, %v540_v46  ;;  %3504 = vmatprep.subr.bf16.mxu0 %v3503_v41  ;;  %v1322_v46 = vld [vmem:[#allocation3 + $0x230] sm:$0xff] }
 0x2e8   : > { %v4283_v57 = vadd.f32 %v909_v56, %v539_v45  ;;  %3506 = vmatpush3.bf16.msra.mxu0 %v3503_v41  ;;  %v3511_v45 = vpack.c.bf16 %v1319_v44, %v1318_v60  ;;  %3508 = vmatprep.subr.bf16.mxu1 %v3507_v62  ;;  %v3519_v4 = vpack.c.bf16 %v1323_v1, %v1322_v46 }
 0x2e9   : > { %3510 = vmatpush3.bf16.msra.mxu1 %v3507_v62 }
 0x2ea   : > { %3040 = vmatprep.mubr.f32.mxu1 %v4283_v57  ;;  %3512 = vmatprep.subr.bf16.mxu1 %v3511_v45 }
 0x2eb   : > { %3041 = vmatmul.mubr.f32.gmra.mrb[30].mxu1 %v4287_v38 }
 0x2ed   : > { %3514 = vmatpush3.bf16.msra.mxu1 %v3511_v45 }
 0x2ee   : > { %3516 = vmatprep.subr.bf16.mxu1 %v3515_v42 }
 0x2f1   : > { %3518 = vmatpush3.bf16.msra.mxu1 %v3515_v42 }
 0x2f2   : > { %3520 = vmatprep.subr.bf16.mxu1 %v3519_v4 }
 0x2f5   : > { %3522 = vmatpush3.bf16.msra.mxu1 %v3519_v4 }
 0x2f6   : > { %3524 = vmatprep.subr.bf16.mxu1 %v3523_v7 }
 0x2f9   : > { %3526 = vmatpush3.bf16.msra.mxu1 %v3523_v7 }
 0x2fa   : > { %3528 = vmatprep.subr.bf16.mxu1 %v3527_v19 }
 0x2fd   : > { %3530 = vmatpush3.bf16.msra.mxu1 %v3527_v19 }
 0x3a2   : > { %v3021_v11 = vpop.f32.mrb[16].mxu1 }
 0x3a3   : > { %v1043_v22 = vadd.f32 %v3021_v11, %v2528_v9  ;;  %v1037_v25 = vpop.f32.mrb[17].mxu1 }
 0x3a4   : > { %v1038_v28 = vadd.f32 %v2528_v9, %v1037_v25  ;;  %v1329_v25 = vld [vmem:[#allocation3 + $0x268] sm:$0xff] }
 0x3a5   : > { %v1117_v17 = vmax.f32 %v1043_v22, 0.0  ;;  %v1328_v22 = vld [vmem:[#allocation3 + $0x260] sm:$0xff] }
 0x3a6   : > { %v1116_v31 = vmax.f32 %v1038_v28, 0.0  ;;  %v3024_v15 = vpop.f32.mrb[18].mxu1  ;;  %v3531_v28 = vpack.c.bf16 %v1329_v25, %v1328_v22 }
 0x3a7   : > { %v1053_v34 = vadd.f32 %v3024_v15, %v2528_v9  ;;  %v1047_v37 = vpop.f32.mrb[19].mxu1  ;;  %v1331_v15 = vld [vmem:[#allocation3 + $0x278] sm:$0xff] }
 0x3a8   : > { %v1048_v40 = vadd.f32 %v2528_v9, %v1047_v37  ;;  %3075 = vmatprep.mubr.f32.mxu0 %v1116_v31  ;;  %3532 = vmatprep.subr.bf16.mxu1 %v3531_v28  ;;  %v1330_v31 = vld [vmem:[#allocation3 + $0x270] sm:$0xff]  ;;  %v1336_v37 = vld [vmem:[#allocation3 + $0x288] sm:$0xff] }
 0x3a9   : > { %3076 = vmatmul.mubr.f32.vlgmr.msra.gmra.mrb[32].mxu0 %v1117_v17  ;;  %v1119_v23 = vmax.f32 %v1053_v34, 0.0  ;;  %3534 = vmatpush3.bf16.msra.mxu1 %v3531_v28  ;;  %v3535_v17 = vpack.c.bf16 %v1331_v15, %v1330_v31  ;;  %v1335_v34 = vld [vmem:[#allocation3 + $0x280] sm:$0xff] }
 0x3aa   : > { %v1118_v43 = vmax.f32 %v1048_v40, 0.0  ;;  %v3027_v21 = vpop.f32.mrb[20].mxu1  ;;  %v1337_v40 = vld [vmem:[#allocation3 + $0x290] sm:$0xff] }
 0x3ab   : > { %v1063_v47 = vadd.f32 %v3027_v21, %v2528_v9  ;;  %v1057_v48 = vpop.f32.mrb[21].mxu1  ;;  %3536 = vmatprep.subr.bf16.mxu1 %v3535_v17 }
 0x3ac   : > { %v1058_v50 = vadd.f32 %v2528_v9, %v1057_v48  ;;  %3078 = vmatprep.mubr.f32.mxu0 %v1118_v43  ;;  %v1338_v43 = vld [vmem:[#allocation3 + $0x298] sm:$0xff] }
 0x3ad   : > { %3079 = vmatmul.mubr.f32.gmra.mrb[34].mxu0 %v1119_v23  ;;  %v1121_v29 = vmax.f32 %v1063_v47, 0.0  ;;  %3538 = vmatpush3.bf16.msra.mxu1 %v3535_v17  ;;  %v3543_v21 = vpack.c.bf16 %v1338_v43, %v1337_v40  ;;  %v1339_v23 = vld [vmem:[#allocation3 + $0x2a0] sm:$0xff]  ;;  %v1340_v47 = vld [vmem:[#allocation3 + $0x2a8] sm:$0xff] }
 0x3ae   : > { %v1120_v51 = vmax.f32 %v1058_v50, 0.0  ;;  %v3030_v27 = vpop.f32.mrb[22].mxu1  ;;  %v3547_v48 = vpack.c.bf16 %v1340_v47, %v1339_v23  ;;  %v1341_v50 = vld [vmem:[#allocation3 + $0x2b0] sm:$0xff] }
 0x3af   : > { %v1073_v52 = vadd.f32 %v3030_v27, %v2528_v9  ;;  %v1067_v53 = vpop.f32.mrb[23].mxu1 }
 0x3b0   : > { %v1068_v54 = vadd.f32 %v2528_v9, %v1067_v53  ;;  %3081 = vmatprep.mubr.f32.mxu0 %v1120_v51  ;;  %v1342_v51 = vld [vmem:[#allocation3 + $0x2b8] sm:$0xff] }
 0x3b1   : > { %3082 = vmatmul.mubr.f32.gmra.mrb[36].mxu0 %v1121_v29  ;;  %v1123_v35 = vmax.f32 %v1073_v52, 0.0  ;;  %v3551_v27 = vpack.c.bf16 %v1342_v51, %v1341_v50  ;;  %v1343_v29 = vld [vmem:[#allocation3 + $0x2c0] sm:$0xff]  ;;  %v1344_v52 = vld [vmem:[#allocation3 + $0x2c8] sm:$0xff] }
 0x3b2   : > { %v1122_v55 = vmax.f32 %v1068_v54, 0.0  ;;  %v3033_v33 = vpop.f32.mrb[24].mxu1  ;;  %v3555_v53 = vpack.c.bf16 %v1344_v52, %v1343_v29  ;;  %v1345_v54 = vld [vmem:[#allocation3 + $0x2d0] sm:$0xff] }
 0x3b3   : > { %v1083_v56 = vadd.f32 %v3033_v33, %v2528_v9  ;;  %v1077_v36 = vpop.f32.mrb[25].mxu1 }
 0x3b4   : > { %v1078_v39 = vadd.f32 %v2528_v9, %v1077_v36  ;;  %3084 = vmatprep.mubr.f32.mxu0 %v1122_v55  ;;  %v1346_v55 = vld [vmem:[#allocation3 + $0x2d8] sm:$0xff] }
 0x3b5   : > { %3085 = vmatmul.mubr.f32.gmra.mrb[38].mxu0 %v1123_v35  ;;  %v1125_v58 = vmax.f32 %v1083_v56, 0.0  ;;  %v3559_v33 = vpack.c.bf16 %v1346_v55, %v1345_v54  ;;  %v1347_v35 = vld [vmem:[#allocation3 + $0x2e0] sm:$0xff]  ;;  %v1348_v56 = vld [vmem:[#allocation3 + $0x2e8] sm:$0xff] }
 0x3b6   : > { %v1124_v41 = vmax.f32 %v1078_v39, 0.0  ;;  %v3036_v49 = vpop.f32.mrb[26].mxu1  ;;  %v3563_v36 = vpack.c.bf16 %v1348_v56, %v1347_v35  ;;  %v4297_v39 = vld [vmem:[%s4667_s4 + $0x3] ss:$0 sm:$0xff] }
 0x3b7   : > { %v1093_v60 = vadd.f32 %v3036_v49, %v2528_v9  ;;  %v1087_v62 = vpop.f32.mrb[27].mxu1 }
 0x3b8   : > { %v1088_v44 = vadd.f32 %v2528_v9, %v1087_v62  ;;  %3087 = vmatprep.mubr.f32.mxu0 %v1124_v41 }
 0x3b9   : > { %3088 = vmatmul.mubr.f32.gmra.mrb[40].mxu0 %v1125_v58  ;;  %v1127_v63 = vmax.f32 %v1093_v60, 0.0 }
 0x3ba   : > { %v1126_v45 = vmax.f32 %v1088_v44, 0.0  ;;  %v3039_v13 = vpop.f32.mrb[28].mxu1 }
 0x3bb   : > { %v1103_v42 = vadd.f32 %v3039_v13, %v2528_v9  ;;  %v1097_v46 = vpop.f32.mrb[29].mxu1 }
 0x3bc   : > { %v1098_v1 = vadd.f32 %v2528_v9, %v1097_v46  ;;  %3090 = vmatprep.mubr.f32.mxu0 %v1126_v45 }
 0x3bd   : > { %3091 = vmatmul.mubr.f32.gmra.mrb[42].mxu0 %v1127_v63  ;;  %v1129_v5 = vmax.f32 %v1103_v42, 0.0 }
 0x3be   : > { %v1128_v4 = vmax.f32 %v1098_v1, 0.0  ;;  %v3042_v3 = vpop.f32.mrb[30].mxu1 }
 0x3bf   : > { %v1113_v7 = vadd.f32 %v3042_v3, %v2528_v9  ;;  %v1107_v10 = vpop.f32.mrb[31].mxu1 }
 0x3c0   : > { %v1108_v16 = vadd.f32 %v2528_v9, %v1107_v10  ;;  %3093 = vmatprep.mubr.f32.mxu0 %v1128_v4  ;;  %v3539_v9 = vpack.c.bf16 %v1336_v37, %v1335_v34 }
 0x3c1   : > { %3094 = vmatmul.mubr.f32.gmra.mrb[44].mxu0 %v1129_v5  ;;  %v1131_v11 = vmax.f32 %v1113_v7, 0.0 }
 0x3c2   : > { %v1130_v19 = vmax.f32 %v1108_v16, 0.0  ;;  %3540 = vmatprep.subr.bf16.mxu0 %v3539_v9 }
 0x3c3   : > { %3542 = vmatpush3.bf16.msra.mxu0 %v3539_v9 }
 0x3c4   : > { %3096 = vmatprep.mubr.f32.mxu0 %v1130_v19  ;;  %3544 = vmatprep.subr.bf16.mxu0 %v3543_v21 }
 0x3c5   : > { %3097 = vmatmul.mubr.f32.gmra.mrb[46].mxu0 %v1131_v11 }
 0x3c7   : > { %3546 = vmatpush3.bf16.msra.mxu0 %v3543_v21 }
 0x3c8   : > { %3548 = vmatprep.subr.bf16.mxu0 %v3547_v48 }
 0x3cb   : > { %3550 = vmatpush3.bf16.msra.mxu0 %v3547_v48 }
 0x3cc   : > { %3552 = vmatprep.subr.bf16.mxu0 %v3551_v27 }
 0x3cf   : > { %3554 = vmatpush3.bf16.msra.mxu0 %v3551_v27 }
 0x3d0   : > { %3556 = vmatprep.subr.bf16.mxu0 %v3555_v53 }
 0x3d3   : > { %3558 = vmatpush3.bf16.msra.mxu0 %v3555_v53 }
 0x3d4   : > { %3560 = vmatprep.subr.bf16.mxu0 %v3559_v33 }
 0x3d7   : > { %3562 = vmatpush3.bf16.msra.mxu0 %v3559_v33 }
 0x3d8   : > { %3564 = vmatprep.subr.bf16.mxu0 %v3563_v36 }
 0x3db   : > { %3566 = vmatpush3.bf16.msra.mxu0 %v3563_v36 }
 0x47c   : > { %v3077_v41 = vpop.f32.mrb[32].mxu0 }
 0x47d   : > { %v1210_v49 = vadd.f32 %v3077_v41, %v4297_v39  ;;  %v1204_v58 = vpop.f32.mrb[33].mxu0 }
 0x47e   : > { %v1205_v60 = vadd.f32 %v4297_v39, %v1204_v58 }
 0x47f   : > { %v1284_v62 = vmax.f32 %v1210_v49, 0.0 }
 0x480   : > { %v1283_v44 = vmax.f32 %v1205_v60, 0.0  ;;  %v3080_v45 = vpop.f32.mrb[34].mxu0 }
 0x481   : > { %v1220_v13 = vadd.f32 %v3080_v45, %v4297_v39  ;;  %v1214_v63 = vpop.f32.mrb[35].mxu0  ;;  %v4307_v1 = vadd.f32 %v1284_v62, %v4205_v61  ;;  %v1705_v45 = vld [vmem:[#allocation3 + $0x308] sm:$0xff] }
 0x482   : > { %v4303_v42 = vadd.f32 %v1283_v44, %v4200_v59  ;;  %v1215_v46 = vadd.f32 %v4297_v39, %v1214_v63  ;;  %v1704_v44 = vld [vmem:[#allocation3 + $0x300] sm:$0xff] }
 0x483   : > { %v1286_v4 = vmax.f32 %v1220_v13, 0.0  ;;  %v1706_v13 = vld [vmem:[#allocation3 + $0x310] sm:$0xff]  ;;  %v3571_v63 = vpack.c.bf16 %v1705_v45, %v1704_v44 }
 0x484   : > { %v1285_v3 = vmax.f32 %v1215_v46, 0.0  ;;  %v3083_v5 = vpop.f32.mrb[36].mxu0  ;;  %3131 = vmatprep.mubr.f32.mxu1 %v4303_v42  ;;  %v1707_v46 = vld [vmem:[#allocation3 + $0x318] sm:$0xff] }
 0x485   : > { %v1230_v7 = vadd.f32 %v3083_v5, %v4297_v39  ;;  %v1224_v10 = vpop.f32.mrb[37].mxu0  ;;  %3132 = vmatmul.mubr.f32.vlgmr.msra.gmra.mrb[32].mxu1 %v4307_v1  ;;  %v4317_v19 = vadd.f32 %v1286_v4, %v4217_v0  ;;  %v3575_v4 = vpack.c.bf16 %v1707_v46, %v1706_v13  ;;  %3572 = vmatprep.subr.bf16.mxu1 %v3571_v63  ;;  %v1710_v5 = vld [vmem:[#allocation3 + $0x330] sm:$0xff] }
 0x486   : > { %v4313_v16 = vadd.f32 %v1285_v3, %v4212_v2  ;;  %v1225_v59 = vadd.f32 %v4297_v39, %v1224_v10  ;;  %v1709_v3 = vld [vmem:[#allocation3 + $0x328] sm:$0xff]  ;;  %3574 = vmatpush3.bf16.msra.mxu1 %v3571_v63 }
 0x487   : > { %v1288_v61 = vmax.f32 %v1230_v7, 0.0  ;;  %3576 = vmatprep.subr.bf16.mxu1 %v3575_v4  ;;  %v1711_v7 = vld [vmem:[#allocation3 + $0x338] sm:$0xff] }
 0x488   : > { %v1287_v11 = vmax.f32 %v1225_v59, 0.0  ;;  %v3086_v22 = vpop.f32.mrb[38].mxu0  ;;  %3134 = vmatprep.mubr.f32.mxu1 %v4313_v16  ;;  %v3583_v10 = vpack.c.bf16 %v1711_v7, %v1710_v5  ;;  %v1712_v59 = vld [vmem:[#allocation3 + $0x340] sm:$0xff] }
 0x489   : > { %v1240_v25 = vadd.f32 %v3086_v22, %v4297_v39  ;;  %v1234_v28 = vpop.f32.mrb[39].mxu0  ;;  %3135 = vmatmul.mubr.f32.gmra.mrb[34].mxu1 %v4317_v19  ;;  %v4327_v15 = vadd.f32 %v1288_v61, %v4229_v6  ;;  %v1713_v61 = vld [vmem:[#allocation3 + $0x348] sm:$0xff]  ;;  %v1714_v22 = vld [vmem:[#allocation3 + $0x350] sm:$0xff] }
 0x48a   : > { %v4323_v31 = vadd.f32 %v1287_v11, %v4224_v8  ;;  %v1235_v2 = vadd.f32 %v4297_v39, %v1234_v28  ;;  %3578 = vmatpush3.bf16.msra.mxu1 %v3575_v4  ;;  %v3587_v11 = vpack.c.bf16 %v1713_v61, %v1712_v59 }
 0x48b   : > { %v1290_v0 = vmax.f32 %v1240_v25, 0.0  ;;  %v1715_v25 = vld [vmem:[#allocation3 + $0x358] sm:$0xff] }
 0x48c   : > { %v1289_v17 = vmax.f32 %v1235_v2, 0.0  ;;  %v3089_v34 = vpop.f32.mrb[40].mxu0  ;;  %3137 = vmatprep.mubr.f32.mxu1 %v4323_v31  ;;  %v3591_v28 = vpack.c.bf16 %v1715_v25, %v1714_v22  ;;  %v2532_v2 = vld [vmem:[%s4667_s4 + $0x4] ss:$0 sm:$0xff] }
 0x48d   : > { %v1250_v37 = vadd.f32 %v3089_v34, %v4297_v39  ;;  %v1244_v40 = vpop.f32.mrb[41].mxu0  ;;  %3138 = vmatmul.mubr.f32.gmra.mrb[36].mxu1 %v4327_v15  ;;  %v4337_v43 = vadd.f32 %v1290_v0, %v4241_v12 }
 0x48e   : > { %v4333_v9 = vadd.f32 %v1289_v17, %v4236_v14  ;;  %v1245_v8 = vadd.f32 %v4297_v39, %v1244_v40 }
 0x48f   : > { %v1292_v6 = vmax.f32 %v1250_v37, 0.0 }
 0x490   : > { %v1291_v21 = vmax.f32 %v1245_v8, 0.0  ;;  %v3092_v23 = vpop.f32.mrb[42].mxu0  ;;  %3140 = vmatprep.mubr.f32.mxu1 %v4333_v9 }
 0x491   : > { %v1260_v47 = vadd.f32 %v3092_v23, %v4297_v39  ;;  %v1254_v48 = vpop.f32.mrb[43].mxu0  ;;  %3141 = vmatmul.mubr.f32.gmra.mrb[38].mxu1 %v4337_v43  ;;  %v4347_v51 = vadd.f32 %v1292_v6, %v4253_v18 }
 0x492   : > { %v4343_v50 = vadd.f32 %v1291_v21, %v4248_v20  ;;  %v1255_v14 = vadd.f32 %v4297_v39, %v1254_v48 }
 0x493   : > { %v1294_v12 = vmax.f32 %v1260_v47, 0.0 }
 0x494   : > { %v1293_v27 = vmax.f32 %v1255_v14, 0.0  ;;  %v3095_v29 = vpop.f32.mrb[44].mxu0  ;;  %3143 = vmatprep.mubr.f32.mxu1 %v4343_v50 }
 0x495   : > { %v1270_v52 = vadd.f32 %v3095_v29, %v4297_v39  ;;  %v1264_v53 = vpop.f32.mrb[45].mxu0  ;;  %3144 = vmatmul.mubr.f32.gmra.mrb[40].mxu1 %v4347_v51  ;;  %v4357_v55 = vadd.f32 %v1294_v12, %v4265_v24 }
 0x496   : > { %v4353_v54 = vadd.f32 %v1293_v27, %v4260_v26  ;;  %v1265_v20 = vadd.f32 %v4297_v39, %v1264_v53 }
 0x497   : > { %v1296_v18 = vmax.f32 %v1270_v52, 0.0 }
 0x498   : > { %v1295_v33 = vmax.f32 %v1265_v20, 0.0  ;;  %v3098_v35 = vpop.f32.mrb[46].mxu0  ;;  %3146 = vmatprep.mubr.f32.mxu1 %v4353_v54 }
 0x499   : > { %v1280_v56 = vadd.f32 %v3098_v35, %v4297_v39  ;;  %v1274_v36 = vpop.f32.mrb[47].mxu0  ;;  %3147 = vmatmul.mubr.f32.gmra.mrb[42].mxu1 %v4357_v55  ;;  %v4367_v49 = vadd.f32 %v1296_v18, %v4277_v30 }
 0x49a   : > { %v4363_v41 = vadd.f32 %v1295_v33, %v4272_v32  ;;  %v1275_v26 = vadd.f32 %v4297_v39, %v1274_v36  ;;  %v1349_v32 = vld [vmem:[#allocation3 + $0x2f0] sm:$0xff]  ;;  %v1350_v39 = vld [vmem:[#allocation3 + $0x2f8] sm:$0xff] }
 0x49b   : > { %v1298_v24 = vmax.f32 %v1280_v56, 0.0  ;;  %v3567_v30 = vpack.c.bf16 %v1350_v39, %v1349_v32 }
 0x49c   : > { %v1297_v58 = vmax.f32 %v1275_v26, 0.0  ;;  %3149 = vmatprep.mubr.f32.mxu1 %v4363_v41 }
 0x49d   : > { %3150 = vmatmul.mubr.f32.gmra.mrb[44].mxu1 %v4367_v49  ;;  %v4375_v62 = vadd.f32 %v1298_v24, %v4287_v38  ;;  %3568 = vmatprep.subr.bf16.mxu0 %v3567_v30 }
 0x49e   : > { %v4372_v60 = vadd.f32 %v1297_v58, %v4283_v57  ;;  %3570 = vmatpush3.bf16.msra.mxu0 %v3567_v30  ;;  %v1708_v57 = vld [vmem:[#allocation3 + $0x320] sm:$0xff] }
 0x49f   : > { %v3579_v38 = vpack.c.bf16 %v1709_v3, %v1708_v57 }
 0x4a0   : > { %3152 = vmatprep.mubr.f32.mxu1 %v4372_v60 }
 0x4a1   : > { %3153 = vmatmul.mubr.f32.gmra.mrb[46].mxu1 %v4375_v62  ;;  %3580 = vmatprep.subr.bf16.mxu1 %v3579_v38 }
 0x4a2   : > { %3582 = vmatpush3.bf16.msra.mxu1 %v3579_v38 }
 0x4a3   : > { %3584 = vmatprep.subr.bf16.mxu1 %v3583_v10 }
 0x4a6   : > { %3586 = vmatpush3.bf16.msra.mxu1 %v3583_v10 }
 0x4a7   : > { %3588 = vmatprep.subr.bf16.mxu1 %v3587_v11 }
 0x4aa   : > { %3590 = vmatpush3.bf16.msra.mxu1 %v3587_v11 }
 0x4ab   : > { %3592 = vmatprep.subr.bf16.mxu1 %v3591_v28 }
 0x4ae   : > { %3594 = vmatpush3.bf16.msra.mxu1 %v3591_v28 }
 0x558   : > { %v3133_v0 = vpop.f32.mrb[32].mxu1 }
 0x559   : > { %v1431_v17 = vadd.f32 %v3133_v0, %v2532_v2  ;;  %v1425_v34 = vpop.f32.mrb[33].mxu1 }
 0x55a   : > { %v1426_v37 = vadd.f32 %v2532_v2, %v1425_v34  ;;  %v1717_v34 = vld [vmem:[#allocation3 + $0x368] sm:$0xff] }
 0x55b   : > { %v1505_v6 = vmax.f32 %v1431_v17, 0.0  ;;  %v1716_v17 = vld [vmem:[#allocation3 + $0x360] sm:$0xff] }
 0x55c   : > { %v1504_v40 = vmax.f32 %v1426_v37, 0.0  ;;  %v3136_v8 = vpop.f32.mrb[34].mxu1  ;;  %v3595_v37 = vpack.c.bf16 %v1717_v34, %v1716_v17 }
 0x55d   : > { %v1441_v21 = vadd.f32 %v3136_v8, %v2532_v2  ;;  %v1435_v23 = vpop.f32.mrb[35].mxu1  ;;  %v1719_v8 = vld [vmem:[#allocation3 + $0x378] sm:$0xff] }
 0x55e   : > { %v1436_v47 = vadd.f32 %v2532_v2, %v1435_v23  ;;  %3187 = vmatprep.mubr.f32.mxu0 %v1504_v40  ;;  %3596 = vmatprep.subr.bf16.mxu1 %v3595_v37  ;;  %v1718_v40 = vld [vmem:[#allocation3 + $0x370] sm:$0xff]  ;;  %v1724_v23 = vld [vmem:[#allocation3 + $0x388] sm:$0xff] }
 0x55f   : > { %3188 = vmatmul.mubr.f32.vlgmr.msra.gmra.mrb[48].mxu0 %v1505_v6  ;;  %v1507_v12 = vmax.f32 %v1441_v21, 0.0  ;;  %3598 = vmatpush3.bf16.msra.mxu1 %v3595_v37  ;;  %v3599_v6 = vpack.c.bf16 %v1719_v8, %v1718_v40  ;;  %v1723_v21 = vld [vmem:[#allocation3 + $0x380] sm:$0xff] }
 0x560   : > { %v1506_v48 = vmax.f32 %v1436_v47, 0.0  ;;  %v3139_v14 = vpop.f32.mrb[36].mxu1  ;;  %v1725_v47 = vld [vmem:[#allocation3 + $0x390] sm:$0xff] }
 0x561   : > { %v1451_v27 = vadd.f32 %v3139_v14, %v2532_v2  ;;  %v1445_v29 = vpop.f32.mrb[37].mxu1  ;;  %3600 = vmatprep.subr.bf16.mxu1 %v3599_v6 }
 0x562   : > { %v1446_v52 = vadd.f32 %v2532_v2, %v1445_v29  ;;  %3190 = vmatprep.mubr.f32.mxu0 %v1506_v48  ;;  %v1726_v48 = vld [vmem:[#allocation3 + $0x398] sm:$0xff] }
 0x563   : > { %3191 = vmatmul.mubr.f32.gmra.mrb[50].mxu0 %v1507_v12  ;;  %v1509_v18 = vmax.f32 %v1451_v27, 0.0  ;;  %3602 = vmatpush3.bf16.msra.mxu1 %v3599_v6  ;;  %v3607_v14 = vpack.c.bf16 %v1726_v48, %v1725_v47  ;;  %v1727_v12 = vld [vmem:[#allocation3 + $0x3a0] sm:$0xff]  ;;  %v1728_v27 = vld [vmem:[#allocation3 + $0x3a8] sm:$0xff] }
 0x564   : > { %v1508_v53 = vmax.f32 %v1446_v52, 0.0  ;;  %v3142_v20 = vpop.f32.mrb[38].mxu1  ;;  %v3611_v29 = vpack.c.bf16 %v1728_v27, %v1727_v12  ;;  %v1729_v52 = vld [vmem:[#allocation3 + $0x3b0] sm:$0xff] }
 0x565   : > { %v1461_v33 = vadd.f32 %v3142_v20, %v2532_v2  ;;  %v1455_v35 = vpop.f32.mrb[39].mxu1 }
 0x566   : > { %v1456_v56 = vadd.f32 %v2532_v2, %v1455_v35  ;;  %3193 = vmatprep.mubr.f32.mxu0 %v1508_v53  ;;  %v1730_v53 = vld [vmem:[#allocation3 + $0x3b8] sm:$0xff] }
 0x567   : > { %3194 = vmatmul.mubr.f32.gmra.mrb[52].mxu0 %v1509_v18  ;;  %v1511_v24 = vmax.f32 %v1461_v33, 0.0  ;;  %v3615_v20 = vpack.c.bf16 %v1730_v53, %v1729_v52  ;;  %v1731_v18 = vld [vmem:[#allocation3 + $0x3c0] sm:$0xff]  ;;  %v1732_v33 = vld [vmem:[#allocation3 + $0x3c8] sm:$0xff] }
 0x568   : > { %v1510_v36 = vmax.f32 %v1456_v56, 0.0  ;;  %v3145_v26 = vpop.f32.mrb[40].mxu1  ;;  %v3619_v35 = vpack.c.bf16 %v1732_v33, %v1731_v18  ;;  %v1733_v56 = vld [vmem:[#allocation3 + $0x3d0] sm:$0xff] }
 0x569   : > { %v1471_v58 = vadd.f32 %v3145_v26, %v2532_v2  ;;  %v1465_v32 = vpop.f32.mrb[41].mxu1 }
 0x56a   : > { %v1466_v39 = vadd.f32 %v2532_v2, %v1465_v32  ;;  %3196 = vmatprep.mubr.f32.mxu0 %v1510_v36  ;;  %v1734_v36 = vld [vmem:[#allocation3 + $0x3d8] sm:$0xff] }
 0x56b   : > { %3197 = vmatmul.mubr.f32.gmra.mrb[54].mxu0 %v1511_v24  ;;  %v1513_v45 = vmax.f32 %v1471_v58, 0.0  ;;  %v3623_v26 = vpack.c.bf16 %v1734_v36, %v1733_v56  ;;  %v1735_v24 = vld [vmem:[#allocation3 + $0x3e0] sm:$0xff]  ;;  %v1736_v58 = vld [vmem:[#allocation3 + $0x3e8] sm:$0xff] }
 0x56c   : > { %v1512_v30 = vmax.f32 %v1466_v39, 0.0  ;;  %v3148_v44 = vpop.f32.mrb[42].mxu1  ;;  %v3627_v32 = vpack.c.bf16 %v1736_v58, %v1735_v24  ;;  %v4385_v39 = vld [vmem:[%s4667_s4 + $0x5] ss:$0 sm:$0xff] }
 0x56d   : > { %v1481_v13 = vadd.f32 %v3148_v44, %v2532_v2  ;;  %v1475_v63 = vpop.f32.mrb[43].mxu1 }
 0x56e   : > { %v1476_v46 = vadd.f32 %v2532_v2, %v1475_v63  ;;  %3199 = vmatprep.mubr.f32.mxu0 %v1512_v30 }
 0x56f   : > { %3200 = vmatmul.mubr.f32.gmra.mrb[56].mxu0 %v1513_v45  ;;  %v1515_v3 = vmax.f32 %v1481_v13, 0.0 }
 0x570   : > { %v1514_v4 = vmax.f32 %v1476_v46, 0.0  ;;  %v3151_v57 = vpop.f32.mrb[44].mxu1 }
 0x571   : > { %v1491_v38 = vadd.f32 %v3151_v57, %v2532_v2  ;;  %v1485_v5 = vpop.f32.mrb[45].mxu1 }
 0x572   : > { %v1486_v7 = vadd.f32 %v2532_v2, %v1485_v5  ;;  %3202 = vmatprep.mubr.f32.mxu0 %v1514_v4 }
 0x573   : > { %3203 = vmatmul.mubr.f32.gmra.mrb[58].mxu0 %v1515_v3  ;;  %v1517_v61 = vmax.f32 %v1491_v38, 0.0 }
 0x574   : > { %v1516_v10 = vmax.f32 %v1486_v7, 0.0  ;;  %v3154_v59 = vpop.f32.mrb[46].mxu1 }
 0x575   : > { %v1501_v11 = vadd.f32 %v3154_v59, %v2532_v2  ;;  %v1495_v22 = vpop.f32.mrb[47].mxu1 }
 0x576   : > { %v1496_v25 = vadd.f32 %v2532_v2, %v1495_v22  ;;  %3205 = vmatprep.mubr.f32.mxu0 %v1516_v10  ;;  %v3603_v2 = vpack.c.bf16 %v1724_v23, %v1723_v21 }
 0x577   : > { %3206 = vmatmul.mubr.f32.gmra.mrb[60].mxu0 %v1517_v61  ;;  %v1519_v0 = vmax.f32 %v1501_v11, 0.0 }
 0x578   : > { %v1518_v28 = vmax.f32 %v1496_v25, 0.0  ;;  %3604 = vmatprep.subr.bf16.mxu0 %v3603_v2 }
 0x579   : > { %3606 = vmatpush3.bf16.msra.mxu0 %v3603_v2 }
 0x57a   : > { %3208 = vmatprep.mubr.f32.mxu0 %v1518_v28  ;;  %3608 = vmatprep.subr.bf16.mxu0 %v3607_v14 }
 0x57b   : > { %3209 = vmatmul.mubr.f32.gmra.mrb[62].mxu0 %v1519_v0 }
 0x57d   : > { %3610 = vmatpush3.bf16.msra.mxu0 %v3607_v14 }
 0x57e   : > { %3612 = vmatprep.subr.bf16.mxu0 %v3611_v29 }
 0x581   : > { %3614 = vmatpush3.bf16.msra.mxu0 %v3611_v29 }
 0x582   : > { %3616 = vmatprep.subr.bf16.mxu0 %v3615_v20 }
 0x585   : > { %3618 = vmatpush3.bf16.msra.mxu0 %v3615_v20 }
 0x586   : > { %3620 = vmatprep.subr.bf16.mxu0 %v3619_v35 }
 0x589   : > { %3622 = vmatpush3.bf16.msra.mxu0 %v3619_v35 }
 0x58a   : > { %3624 = vmatprep.subr.bf16.mxu0 %v3623_v26 }
 0x58d   : > { %3626 = vmatpush3.bf16.msra.mxu0 %v3623_v26 }
 0x58e   : > { %3628 = vmatprep.subr.bf16.mxu0 %v3627_v32 }
 0x591   : > { %3630 = vmatpush3.bf16.msra.mxu0 %v3627_v32 }
 0x632   : > { %v3189_v30 = vpop.f32.mrb[48].mxu0 }
 0x633   : > { %v1598_v44 = vadd.f32 %v3189_v30, %v4385_v39  ;;  %v1592_v45 = vpop.f32.mrb[49].mxu0 }
 0x634   : > { %v1593_v13 = vadd.f32 %v4385_v39, %v1592_v45 }
 0x635   : > { %v1672_v63 = vmax.f32 %v1598_v44, 0.0 }
 0x636   : > { %v1671_v46 = vmax.f32 %v1593_v13, 0.0  ;;  %v3192_v4 = vpop.f32.mrb[50].mxu0 }
 0x637   : > { %v1608_v57 = vadd.f32 %v3192_v4, %v4385_v39  ;;  %v1602_v3 = vpop.f32.mrb[51].mxu0  ;;  %v4395_v7 = vadd.f32 %v1672_v63, %v4307_v1 }
 0x638   : > { %v4391_v38 = vadd.f32 %v1671_v46, %v4303_v42  ;;  %v1603_v5 = vadd.f32 %v4385_v39, %v1602_v3  ;;  %v2123_v46 = vld [vmem:[%s4668_s5] sm:$0xff] }
 0x639   : > { %v1674_v10 = vmax.f32 %v1608_v57, 0.0  ;;  %v2126_v57 = vld [vmem:[%s4668_s5 + $0x18] sm:$0xff] }
 0x63a   : > { %v1673_v59 = vmax.f32 %v1603_v5, 0.0  ;;  %v3195_v61 = vpop.f32.mrb[52].mxu0  ;;  %3243 = vmatprep.mubr.f32.mxu1 %v4391_v38  ;;  %v2127_v5 = vld [vmem:[%s4668_s5 + $0x20] sm:$0xff] }
 0x63b   : > { %v1618_v11 = vadd.f32 %v3195_v61, %v4385_v39  ;;  %v1612_v22 = vpop.f32.mrb[53].mxu0  ;;  %3244 = vmatmul.mubr.f32.vlgmr.msra.gmra.mrb[48].mxu1 %v4395_v7  ;;  %v4405_v28 = vadd.f32 %v1674_v10, %v4317_v19  ;;  %v2128_v10 = vld [vmem:[%s4668_s5 + $0x28] sm:$0xff]  ;;  %v2129_v61 = vld [vmem:[%s4668_s5 + $0x30] sm:$0xff] }
 0x63c   : > { %v4401_v25 = vadd.f32 %v1673_v59, %v4313_v16  ;;  %v1613_v42 = vadd.f32 %v4385_v39, %v1612_v22  ;;  %v3643_v59 = vpack.c.bf16 %v2128_v10, %v2127_v5 }
 0x63d   : > { %v1676_v1 = vmax.f32 %v1618_v11, 0.0  ;;  %v2130_v11 = vld [vmem:[%s4668_s5 + $0x38] sm:$0xff] }
 0x63e   : > { %v1675_v0 = vmax.f32 %v1613_v42, 0.0  ;;  %v3198_v17 = vpop.f32.mrb[54].mxu0  ;;  %3246 = vmatprep.mubr.f32.mxu1 %v4401_v25  ;;  %v3647_v22 = vpack.c.bf16 %v2130_v11, %v2129_v61  ;;  %v2131_v42 = vld [vmem:[%s4668_s5 + $0x40] sm:$0xff] }
 0x63f   : > { %v1628_v34 = vadd.f32 %v3198_v17, %v4385_v39  ;;  %v1622_v37 = vpop.f32.mrb[55].mxu0  ;;  %3247 = vmatmul.mubr.f32.gmra.mrb[50].mxu1 %v4405_v28  ;;  %v4415_v8 = vadd.f32 %v1676_v1, %v4327_v15  ;;  %v2132_v1 = vld [vmem:[%s4668_s5 + $0x48] sm:$0xff]  ;;  %v2133_v17 = vld [vmem:[%s4668_s5 + $0x50] sm:$0xff] }
 0x640   : > { %v4411_v40 = vadd.f32 %v1675_v0, %v4323_v31  ;;  %v1623_v16 = vadd.f32 %v4385_v39, %v1622_v37  ;;  %v4497_v0 = vpack.c.bf16 %v2132_v1, %v2131_v42 }
 0x641   : > { %v1678_v19 = vmax.f32 %v1628_v34, 0.0  ;;  %v2134_v34 = vld [vmem:[%s4668_s5 + $0x58] sm:$0xff] }
 0x642   : > { %v1677_v6 = vmax.f32 %v1623_v16, 0.0  ;;  %v3201_v21 = vpop.f32.mrb[56].mxu0  ;;  %3249 = vmatprep.mubr.f32.mxu1 %v4411_v40  ;;  %v4506_v37 = vpack.c.bf16 %v2134_v34, %v2133_v17  ;;  %v4514_v16 = vld [vmem:[%s4667_s4 + $0x6] ss:$0 sm:$0xff] }
 0x643   : > { %v1638_v23 = vadd.f32 %v3201_v21, %v4385_v39  ;;  %v1632_v47 = vpop.f32.mrb[57].mxu0  ;;  %3250 = vmatmul.mubr.f32.gmra.mrb[52].mxu1 %v4415_v8  ;;  %v4425_v48 = vadd.f32 %v1678_v19, %v4337_v43 }
 0x644   : > { %v4421_v2 = vadd.f32 %v1677_v6, %v4333_v9  ;;  %v1633_v31 = vadd.f32 %v4385_v39, %v1632_v47 }
 0x645   : > { %v1680_v15 = vmax.f32 %v1638_v23, 0.0 }
 0x646   : > { %v1679_v14 = vmax.f32 %v1633_v31, 0.0  ;;  %v3204_v12 = vpop.f32.mrb[58].mxu0  ;;  %3252 = vmatprep.mubr.f32.mxu1 %v4421_v2 }
 0x647   : > { %v1648_v27 = vadd.f32 %v3204_v12, %v4385_v39  ;;  %v1642_v29 = vpop.f32.mrb[59].mxu0  ;;  %3253 = vmatmul.mubr.f32.gmra.mrb[54].mxu1 %v4425_v48  ;;  %v4435_v53 = vadd.f32 %v1680_v15, %v4347_v51 }
 0x648   : > { %v4431_v52 = vadd.f32 %v1679_v14, %v4343_v50  ;;  %v1643_v9 = vadd.f32 %v4385_v39, %v1642_v29 }
 0x649   : > { %v1682_v43 = vmax.f32 %v1648_v27, 0.0 }
 0x64a   : > { %v1681_v20 = vmax.f32 %v1643_v9, 0.0  ;;  %v3207_v18 = vpop.f32.mrb[60].mxu0  ;;  %3255 = vmatprep.mubr.f32.mxu1 %v4431_v52 }
 0x64b   : > { %v1658_v33 = vadd.f32 %v3207_v18, %v4385_v39  ;;  %v1652_v35 = vpop.f32.mrb[61].mxu0  ;;  %3256 = vmatmul.mubr.f32.gmra.mrb[56].mxu1 %v4435_v53  ;;  %v4445_v36 = vadd.f32 %v1682_v43, %v4357_v55 }
 0x64c   : > { %v4441_v56 = vadd.f32 %v1681_v20, %v4353_v54  ;;  %v1653_v50 = vadd.f32 %v4385_v39, %v1652_v35 }
 0x64d   : > { %v1684_v51 = vmax.f32 %v1658_v33, 0.0 }
 0x64e   : > { %v1683_v26 = vmax.f32 %v1653_v50, 0.0  ;;  %v3210_v24 = vpop.f32.mrb[62].mxu0  ;;  %3258 = vmatprep.mubr.f32.mxu1 %v4441_v56 }
 0x64f   : > { %v1668_v58 = vadd.f32 %v3210_v24, %v4385_v39  ;;  %v1662_v32 = vpop.f32.mrb[63].mxu0  ;;  %3259 = vmatmul.mubr.f32.gmra.mrb[58].mxu1 %v4445_v36  ;;  %v4455_v44 = vadd.f32 %v1684_v51, %v4367_v49 }
 0x650   : > { %v4451_v30 = vadd.f32 %v1683_v26, %v4363_v41  ;;  %v1663_v54 = vadd.f32 %v4385_v39, %v1662_v32  ;;  %v1737_v41 = vld [vmem:[#allocation3 + $0x3f0] sm:$0xff]  ;;  %v1738_v39 = vld [vmem:[#allocation3 + $0x3f8] sm:$0xff] }
 0x651   : > { %v1686_v55 = vmax.f32 %v1668_v58, 0.0  ;;  %v3631_v49 = vpack.c.bf16 %v1738_v39, %v1737_v41 }
 0x652   : > { %v1685_v45 = vmax.f32 %v1663_v54, 0.0  ;;  %3261 = vmatprep.mubr.f32.mxu1 %v4451_v30 }
 0x653   : > { %3262 = vmatmul.mubr.f32.gmra.mrb[60].mxu1 %v4455_v44  ;;  %v4463_v63 = vadd.f32 %v1686_v55, %v4375_v62  ;;  %3632 = vmatprep.subr.bf16.mxu0 %v3631_v49  ;;  %v2125_v62 = vld [vmem:[%s4668_s5 + $0x10] sm:$0xff] }
 0x654   : > { %v4460_v13 = vadd.f32 %v1685_v45, %v4372_v60  ;;  %3634 = vmatpush3.bf16.msra.mxu0 %v3631_v49  ;;  %v2124_v60 = vld [vmem:[%s4668_s5 + $0x8] sm:$0xff]  ;;  %v3639_v3 = vpack.c.bf16 %v2126_v57, %v2125_v62 }
 0x655   : > { %v3635_v4 = vpack.c.bf16 %v2124_v60, %v2123_v46 }
 0x656   : > { %3264 = vmatprep.mubr.f32.mxu1 %v4460_v13 }
 0x657   : > { %3265 = vmatmul.mubr.f32.gmra.mrb[62].mxu1 %v4463_v63  ;;  %3636 = vmatprep.subr.bf16.mxu0 %v3635_v4 }
 0x658   : > { %3667 = vmatprep.subr.bf16.mxu1 %v3635_v4 }
 0x659   : > { %3675 = vmatpush3.bf16.msra.mxu1 %v3635_v4 }
 0x65a   : > { %3668 = vmatprep.subr.bf16.mxu1 %v3639_v3 }
 0x65d   : > { %3676 = vmatpush3.bf16.msra.mxu1 %v3639_v3 }
 0x65e   : > { %3669 = vmatprep.subr.bf16.mxu1 %v3643_v59 }
 0x661   : > { %3677 = vmatpush3.bf16.msra.mxu1 %v3643_v59 }
 0x662   : > { %3670 = vmatprep.subr.bf16.mxu1 %v3647_v22 }
 0x665   : > { %3678 = vmatpush3.bf16.msra.mxu1 %v3647_v22 }
 0x666   : > { %3671 = vmatprep.subr.bf16.mxu1 %v4497_v0 }
 0x669   : > { %3679 = vmatpush3.bf16.msra.mxu1 %v4497_v0 }
 0x66a   : > { %3672 = vmatprep.subr.bf16.mxu1 %v4506_v37 }
 0x66d   : > { %3680 = vmatpush3.bf16.msra.mxu1 %v4506_v37 }
 0x70e   : > { %v3245_v19 = vpop.f32.mrb[48].mxu1 }
 0x70f   : > { %v1819_v6 = vadd.f32 %v3245_v19, %v4514_v16  ;;  %v1813_v21 = vpop.f32.mrb[49].mxu1 }
 0x710   : > { %v1814_v23 = vadd.f32 %v4514_v16, %v1813_v21  ;;  %v2135_v21 = vld [vmem:[%s4668_s5 + $0x60] sm:$0xff] }
 0x711   : > { %v1893_v15 = vmax.f32 %v1819_v6, 0.0 }
 0x712   : > { %v1892_v47 = vmax.f32 %v1814_v23, 0.0  ;;  %v3248_v31 = vpop.f32.mrb[50].mxu1 }
 0x713   : > { %v1829_v14 = vadd.f32 %v3248_v31, %v4514_v16  ;;  %v1823_v12 = vpop.f32.mrb[51].mxu1 }
 0x714   : > { %v1824_v27 = vadd.f32 %v4514_v16, %v1823_v12  ;;  %3299 = vmatprep.mubr.f32.mxu0 %v1892_v47  ;;  %v2138_v47 = vld [vmem:[%s4668_s5 + $0x78] sm:$0xff] }
 0x715   : > { %3300 = vmatmul.mubr.f32.vlgmr.msra.gmra.mrb[64].mxu0 %v1893_v15  ;;  %v1895_v43 = vmax.f32 %v1829_v14, 0.0  ;;  %v4551_v15 = vld [vmem:[%s4667_s4 + $0x7] ss:$0 sm:$0xff] }
 0x716   : > { %v1894_v29 = vmax.f32 %v1824_v27, 0.0  ;;  %v3251_v9 = vpop.f32.mrb[52].mxu1  ;;  %3638 = vmatpush3.bf16.msra.mxu0 %v3635_v4 }
 0x717   : > { %v1839_v20 = vadd.f32 %v3251_v9, %v4514_v16  ;;  %v1833_v18 = vpop.f32.mrb[53].mxu1  ;;  %3640 = vmatprep.subr.bf16.mxu0 %v3639_v3 }
 0x718   : > { %v1834_v33 = vadd.f32 %v4514_v16, %v1833_v18  ;;  %3302 = vmatprep.mubr.f32.mxu0 %v1894_v29 }
 0x719   : > { %3303 = vmatmul.mubr.f32.gmra.mrb[66].mxu0 %v1895_v43  ;;  %v1897_v51 = vmax.f32 %v1839_v20, 0.0 }
 0x71a   : > { %v1896_v35 = vmax.f32 %v1834_v33, 0.0  ;;  %v3254_v50 = vpop.f32.mrb[54].mxu1  ;;  %3642 = vmatpush3.bf16.msra.mxu0 %v3639_v3 }
 0x71b   : > { %v1849_v26 = vadd.f32 %v3254_v50, %v4514_v16  ;;  %v1843_v24 = vpop.f32.mrb[55].mxu1  ;;  %3644 = vmatprep.subr.bf16.mxu0 %v3643_v59 }
 0x71c   : > { %v1844_v58 = vadd.f32 %v4514_v16, %v1843_v24  ;;  %3305 = vmatprep.mubr.f32.mxu0 %v1896_v35 }
 0x71d   : > { %3306 = vmatmul.mubr.f32.gmra.mrb[68].mxu0 %v1897_v51  ;;  %v1899_v55 = vmax.f32 %v1849_v26, 0.0 }
 0x71e   : > { %v1898_v32 = vmax.f32 %v1844_v58, 0.0  ;;  %v3257_v54 = vpop.f32.mrb[56].mxu1  ;;  %3646 = vmatpush3.bf16.msra.mxu0 %v3643_v59 }
 0x71f   : > { %v1859_v45 = vadd.f32 %v3257_v54, %v4514_v16  ;;  %v1853_v41 = vpop.f32.mrb[57].mxu1  ;;  %3648 = vmatprep.subr.bf16.mxu0 %v3647_v22 }
 0x720   : > { %v1854_v39 = vadd.f32 %v4514_v16, %v1853_v41  ;;  %3308 = vmatprep.mubr.f32.mxu0 %v1898_v32 }
 0x721   : > { %3309 = vmatmul.mubr.f32.gmra.mrb[70].mxu0 %v1899_v55  ;;  %v1901_v60 = vmax.f32 %v1859_v45, 0.0 }
 0x722   : > { %v1900_v49 = vmax.f32 %v1854_v39, 0.0  ;;  %v3260_v46 = vpop.f32.mrb[58].mxu1  ;;  %3650 = vmatpush3.bf16.msra.mxu0 %v3647_v22 }
 0x723   : > { %v1869_v62 = vadd.f32 %v3260_v46, %v4514_v16  ;;  %v1863_v4 = vpop.f32.mrb[59].mxu1  ;;  %3652 = vmatprep.subr.bf16.mxu0 %v4497_v0 }
 0x724   : > { %v1864_v57 = vadd.f32 %v4514_v16, %v1863_v4  ;;  %3311 = vmatprep.mubr.f32.mxu0 %v1900_v49 }
 0x725   : > { %3312 = vmatmul.mubr.f32.gmra.mrb[72].mxu0 %v1901_v60  ;;  %v1903_v10 = vmax.f32 %v1869_v62, 0.0 }
 0x726   : > { %v1902_v3 = vmax.f32 %v1864_v57, 0.0  ;;  %v3263_v5 = vpop.f32.mrb[60].mxu1  ;;  %3654 = vmatpush3.bf16.msra.mxu0 %v4497_v0 }
 0x727   : > { %v1879_v59 = vadd.f32 %v3263_v5, %v4514_v16  ;;  %v1873_v61 = vpop.f32.mrb[61].mxu1  ;;  %3656 = vmatprep.subr.bf16.mxu0 %v4506_v37 }
 0x728   : > { %v1874_v11 = vadd.f32 %v4514_v16, %v1873_v61  ;;  %3314 = vmatprep.mubr.f32.mxu0 %v1902_v3 }
 0x729   : > { %3315 = vmatmul.mubr.f32.gmra.mrb[74].mxu0 %v1903_v10  ;;  %v1905_v1 = vmax.f32 %v1879_v59, 0.0 }
 0x72a   : > { %v1904_v22 = vmax.f32 %v1874_v11, 0.0  ;;  %v3266_v42 = vpop.f32.mrb[62].mxu1  ;;  %3658 = vmatpush3.bf16.msra.mxu0 %v4506_v37  ;;  %v2136_v37 = vld [vmem:[%s4668_s5 + $0x68] sm:$0xff] }
 0x72b   : > { %v1889_v17 = vadd.f32 %v3266_v42, %v4514_v16  ;;  %v1883_v34 = vpop.f32.mrb[63].mxu1  ;;  %v3659_v23 = vpack.c.bf16 %v2136_v37, %v2135_v21 }
 0x72c   : > { %v1884_v0 = vadd.f32 %v4514_v16, %v1883_v34  ;;  %3317 = vmatprep.mubr.f32.mxu0 %v1904_v22  ;;  %v2137_v16 = vld [vmem:[%s4668_s5 + $0x70] sm:$0xff] }
 0x72d   : > { %3318 = vmatmul.mubr.f32.gmra.mrb[76].mxu0 %v1905_v1  ;;  %v1907_v6 = vmax.f32 %v1889_v17, 0.0  ;;  %3660 = vmatprep.subr.bf16.mxu0 %v3659_v23  ;;  %v3663_v31 = vpack.c.bf16 %v2138_v47, %v2137_v16 }
 0x72e   : > { %v1906_v19 = vmax.f32 %v1884_v0, 0.0  ;;  %3673 = vmatprep.subr.bf16.mxu1 %v3659_v23  ;;  %3662 = vmatpush3.bf16.msra.mxu0 %v3659_v23 }
 0x72f   : > { %3681 = vmatpush3.bf16.msra.mxu1 %v3659_v23  ;;  %3664 = vmatprep.subr.bf16.mxu0 %v3663_v31 }
 0x730   : > { %3320 = vmatprep.mubr.f32.mxu0 %v1906_v19  ;;  %3674 = vmatprep.subr.bf16.mxu1 %v3663_v31 }
 0x731   : > { %3321 = vmatmul.mubr.f32.gmra.mrb[78].mxu0 %v1907_v6 }
 0x732   : > { %3666 = vmatpush3.bf16.msra.mxu0 %v3663_v31 }
 0x733   : > { %3682 = vmatpush3.bf16.msra.mxu1 %v3663_v31 }
 0x7e8   : > { %v3301_v14 = vpop.f32.mrb[64].mxu0 }
 0x7e9   : > { %v1986_v12 = vadd.f32 %v3301_v14, %v4551_v15  ;;  %v1980_v27 = vpop.f32.mrb[65].mxu0 }
 0x7ea   : > { %v1981_v29 = vadd.f32 %v4551_v15, %v1980_v27 }
 0x7eb   : > { %v2060_v9 = vmax.f32 %v1986_v12, 0.0 }
 0x7ec   : > { %v2059_v43 = vmax.f32 %v1981_v29, 0.0  ;;  %v3304_v20 = vpop.f32.mrb[66].mxu0 }
 0x7ed   : > { %v1996_v18 = vadd.f32 %v3304_v20, %v4551_v15  ;;  %v1990_v33 = vpop.f32.mrb[67].mxu0  ;;  %v2076_v51 = vadd.f32 %v2060_v9, %v4395_v7 }
 0x7ee   : > { %v2075_v35 = vadd.f32 %v2059_v43, %v4391_v38  ;;  %v1991_v50 = vadd.f32 %v4551_v15, %v1990_v33 }
 0x7ef   : > { %v2062_v26 = vmax.f32 %v1996_v18, 0.0 }
 0x7f0   : > { %v2061_v24 = vmax.f32 %v1991_v50, 0.0  ;;  %v3307_v58 = vpop.f32.mrb[68].mxu0  ;;  %3355 = vmatprep.mubr.f32.mxu0 %v2075_v35 }
 0x7f1   : > { %v2006_v32 = vadd.f32 %v3307_v58, %v4551_v15  ;;  %v2000_v54 = vpop.f32.mrb[69].mxu0  ;;  %3356 = vmatmul.mubr.f32.vlgmr.msra.gmra.mrb[80].mxu0 %v2076_v51  ;;  %v2078_v41 = vadd.f32 %v2062_v26, %v4405_v28 }
 0x7f2   : > { %v2077_v55 = vadd.f32 %v2061_v24, %v4401_v25  ;;  %v2001_v45 = vadd.f32 %v4551_v15, %v2000_v54 }
 0x7f3   : > { %v2064_v39 = vmax.f32 %v2006_v32, 0.0 }
 0x7f4   : > { %v2063_v38 = vmax.f32 %v2001_v45, 0.0  ;;  %v3310_v49 = vpop.f32.mrb[70].mxu0  ;;  %3358 = vmatprep.mubr.f32.mxu0 %v2077_v55 }
 0x7f5   : > { %v2016_v7 = vadd.f32 %v3310_v49, %v4551_v15  ;;  %v2010_v46 = vpop.f32.mrb[71].mxu0  ;;  %3359 = vmatmul.mubr.f32.gmra.mrb[82].mxu0 %v2078_v41  ;;  %v2080_v4 = vadd.f32 %v2064_v39, %v4415_v8 }
 0x7f6   : > { %v2079_v60 = vadd.f32 %v2063_v38, %v4411_v40  ;;  %v2011_v62 = vadd.f32 %v4551_v15, %v2010_v46 }
 0x7f7   : > { %v2066_v57 = vmax.f32 %v2016_v7, 0.0 }
 0x7f8   : > { %v2065_v25 = vmax.f32 %v2011_v62, 0.0  ;;  %v3313_v3 = vpop.f32.mrb[72].mxu0  ;;  %3361 = vmatprep.mubr.f32.mxu0 %v2079_v60 }
 0x7f9   : > { %v2026_v28 = vadd.f32 %v3313_v3, %v4551_v15  ;;  %v2020_v5 = vpop.f32.mrb[73].mxu0  ;;  %3362 = vmatmul.mubr.f32.gmra.mrb[84].mxu0 %v2080_v4  ;;  %v2082_v61 = vadd.f32 %v2066_v57, %v4425_v48 }
 0x7fa   : > { %v2081_v10 = vadd.f32 %v2065_v25, %v4421_v2  ;;  %v2021_v59 = vadd.f32 %v4551_v15, %v2020_v5 }
 0x7fb   : > { %v2068_v11 = vmax.f32 %v2026_v28, 0.0 }
 0x7fc   : > { %v2067_v40 = vmax.f32 %v2021_v59, 0.0  ;;  %v3316_v22 = vpop.f32.mrb[74].mxu0  ;;  %3364 = vmatprep.mubr.f32.mxu1 %v2081_v10 }
 0x7fd   : > { %v2036_v8 = vadd.f32 %v3316_v22, %v4551_v15  ;;  %v2030_v42 = vpop.f32.mrb[75].mxu0  ;;  %3365 = vmatmul.mubr.f32.vlgmr.msra.gmra.mrb[64].mxu1 %v2082_v61  ;;  %v2084_v34 = vadd.f32 %v2068_v11, %v4435_v53 }
 0x7fe   : > { %v2083_v1 = vadd.f32 %v2067_v40, %v4431_v52  ;;  %v2031_v17 = vadd.f32 %v4551_v15, %v2030_v42 }
 0x7ff   : > { %v2070_v0 = vmax.f32 %v2036_v8, 0.0 }
 0x800   : > { %v2069_v2 = vmax.f32 %v2031_v17, 0.0  ;;  %v3319_v19 = vpop.f32.mrb[76].mxu0  ;;  %3367 = vmatprep.mubr.f32.mxu1 %v2083_v1 }
 0x801   : > { %v2046_v48 = vadd.f32 %v3319_v19, %v4551_v15  ;;  %v2040_v6 = vpop.f32.mrb[77].mxu0  ;;  %3368 = vmatmul.mubr.f32.gmra.mrb[66].mxu1 %v2084_v34  ;;  %v2086_v23 = vadd.f32 %v2070_v0, %v4445_v36 }
 0x802   : > { %v2085_v21 = vadd.f32 %v2069_v2, %v4441_v56  ;;  %v2041_v37 = vadd.f32 %v4551_v15, %v2040_v6 }
 0x803   : > { %v2072_v16 = vmax.f32 %v2046_v48, 0.0 }
 0x804   : > { %v2071_v52 = vmax.f32 %v2041_v37, 0.0  ;;  %v3322_v47 = vpop.f32.mrb[78].mxu0  ;;  %3370 = vmatprep.mubr.f32.mxu1 %v2085_v21 }
 0x805   : > { %v2056_v53 = vadd.f32 %v3322_v47, %v4551_v15  ;;  %v2050_v31 = vpop.f32.mrb[79].mxu0  ;;  %3371 = vmatmul.mubr.f32.gmra.mrb[68].mxu1 %v2086_v23  ;;  %v2088_v27 = vadd.f32 %v2072_v16, %v4455_v44 }
 0x806   : > { %v2087_v14 = vadd.f32 %v2071_v52, %v4451_v30  ;;  %v2051_v12 = vadd.f32 %v4551_v15, %v2050_v31 }
 0x807   : > { %v2074_v29 = vmax.f32 %v2056_v53, 0.0 }
 0x808   : > { %v2073_v56 = vmax.f32 %v2051_v12, 0.0  ;;  %3373 = vmatprep.mubr.f32.mxu1 %v2087_v14 }
 0x809   : > { %3374 = vmatmul.mubr.f32.gmra.mrb[70].mxu1 %v2088_v27  ;;  %v2090_v9 = vadd.f32 %v2074_v29, %v4463_v63 }
 0x80a   : > { %v2089_v36 = vadd.f32 %v2073_v56, %v4460_v13 }
 0x80c   : > { %3376 = vmatprep.mubr.f32.mxu1 %v2089_v36 }
 0x80d   : > { %3377 = vmatmul.mubr.f32.gmra.mrb[72].mxu1 %v2090_v9 }
 0x8c4   : > { %v3357_v43 = vpop.f32.mrb[80].mxu0 }
 0x8c5   : > { %v2285_v20 = vsub.f32 0.0, %v3357_v43  ;;  %v2205_v18 = vpop.f32.mrb[81].mxu0 }
 0x8c6   : > { %v2284_v33 = vsub.f32 0.0, %v2205_v18 }
 0x8c7   : > { %v2302_v35 = vmul.f32 1.442695, %v2285_v20 }
 0x8c8   : > { %v2300_v30 = vmul.f32 1.442695, %v2284_v33  ;;  %v3360_v50 = vpop.f32.mrb[82].mxu0 }
 0x8c9   : > { %3753 = vpow2.f32 %v2302_v35  ;;  %v2287_v15 = vsub.f32 0.0, %v3360_v50  ;;  %v2215_v44 = vpop.f32.mrb[83].mxu0 }
 0x8ca   : > { %3755 = vpow2.f32 %v2300_v30  ;;  %v2286_v51 = vsub.f32 0.0, %v2215_v44 }
 0x8cb   : > { %v2306_v26 = vmul.f32 1.442695, %v2287_v15 }
 0x8cc   : > { %v2304_v24 = vmul.f32 1.442695, %v2286_v51  ;;  %v3363_v58 = vpop.f32.mrb[84].mxu0 }
 0x8cd   : > { %3757 = vpow2.f32 %v2306_v26  ;;  %v2289_v13 = vsub.f32 0.0, %v3363_v58  ;;  %v2225_v63 = vpop.f32.mrb[85].mxu0 }
 0x8ce   : > { %3759 = vpow2.f32 %v2304_v24  ;;  %v2288_v32 = vsub.f32 0.0, %v2225_v63 }
 0x8cf   : > { %v2310_v54 = vmul.f32 1.442695, %v2289_v13 }
 0x8d0   : > { %v2308_v55 = vmul.f32 1.442695, %v2288_v32  ;;  %v3366_v45 = vpop.f32.mrb[64].mxu1 }
 0x8d1   : > { %3761 = vpow2.f32 %v2310_v54  ;;  %v2291_v41 = vsub.f32 0.0, %v3366_v45  ;;  %v2235_v39 = vpop.f32.mrb[65].mxu1 }
 0x8d2   : > { %3763 = vpow2.f32 %v2308_v55  ;;  %v2290_v38 = vsub.f32 0.0, %v2235_v39 }
 0x8d3   : > { %v3754_v49 = vpop.eup %3753  ;;  %v2314_v7 = vmul.f32 1.442695, %v2291_v41 }
 0x8d4   : > { %v3756_v46 = vpop.eup %3755  ;;  %v2333_v60 = vadd.f32 1.0, %v3754_v49  ;;  %v2312_v62 = vmul.f32 1.442695, %v2290_v38  ;;  %v3369_v4 = vpop.f32.mrb[66].mxu1 }
 0x8d5   : > { %v2332_v57 = vadd.f32 1.0, %v3756_v46  ;;  %3765 = vpow2.f32 %v2314_v7  ;;  %v2293_v25 = vsub.f32 0.0, %v3369_v4  ;;  %v2245_v3 = vpop.f32.mrb[67].mxu1 }
 0x8d6   : > { %3767 = vrcp.f32 %v2333_v60  ;;  %v2292_v28 = vsub.f32 0.0, %v2245_v3 }
 0x8d7   : > { %v3758_v5 = vpop.eup %3757  ;;  %3769 = vrcp.f32 %v2332_v57  ;;  %v2318_v10 = vmul.f32 1.442695, %v2293_v25 }
 0x8d8   : > { %v3760_v59 = vpop.eup %3759  ;;  %v2335_v61 = vadd.f32 1.0, %v3758_v5  ;;  %3771 = vpow2.f32 %v2312_v62  ;;  %v2316_v11 = vmul.f32 1.442695, %v2292_v28  ;;  %v3372_v40 = vpop.f32.mrb[68].mxu1 }
 0x8d9   : > { %v2334_v22 = vadd.f32 1.0, %v3760_v59  ;;  %3773 = vpow2.f32 %v2318_v10  ;;  %v2295_v8 = vsub.f32 0.0, %v3372_v40  ;;  %v2255_v42 = vpop.f32.mrb[69].mxu1 }
 0x8da   : > { %3775 = vrcp.f32 %v2335_v61  ;;  %v2294_v1 = vsub.f32 0.0, %v2255_v42 }
 0x8db   : > { %v3762_v17 = vpop.eup %3761  ;;  %3777 = vrcp.f32 %v2334_v22  ;;  %v2322_v34 = vmul.f32 1.442695, %v2295_v8 }
 0x8dc   : > { %v3764_v0 = vpop.eup %3763  ;;  %v2337_v2 = vadd.f32 1.0, %v3762_v17  ;;  %3779 = vpow2.f32 %v2316_v11  ;;  %v2320_v19 = vmul.f32 1.442695, %v2294_v1  ;;  %v3375_v48 = vpop.f32.mrb[70].mxu1 }
 0x8dd   : > { %v2336_v6 = vadd.f32 1.0, %v3764_v0  ;;  %3781 = vpow2.f32 %v2322_v34  ;;  %v2297_v21 = vsub.f32 0.0, %v3375_v48  ;;  %v2265_v37 = vpop.f32.mrb[71].mxu1 }
 0x8de   : > { %3783 = vrcp.f32 %v2337_v2  ;;  %v2296_v23 = vsub.f32 0.0, %v2265_v37 }
 0x8df   : > { %v3766_v16 = vpop.eup %3765  ;;  %3785 = vrcp.f32 %v2336_v6  ;;  %v2326_v52 = vmul.f32 1.442695, %v2297_v21 }
 0x8e0   : > { %v3768_v47 = vpop.eup %3767  ;;  %v2339_v53 = vadd.f32 1.0, %v3766_v16  ;;  %3787 = vpow2.f32 %v2320_v19  ;;  %v2324_v31 = vmul.f32 1.442695, %v2296_v23  ;;  %v3378_v14 = vpop.f32.mrb[72].mxu1 }
 0x8e1   : > { %v3770_v12 = vpop.eup %3769  ;;  %2365 = vst [vmem:[%s4588_s20 + $0x8] sm:$0xff] %v3768_v47  ;;  %3789 = vpow2.f32 %v2326_v52  ;;  %v2299_v27 = vsub.f32 0.0, %v3378_v14  ;;  %v2275_v29 = vpop.f32.mrb[73].mxu1 }
 0x8e2   : > { %v3772_v56 = vpop.eup %3771  ;;  %2364 = vst [vmem:[%s4588_s20] sm:$0xff] %v3770_v12  ;;  %3791 = vrcp.f32 %v2339_v53  ;;  %v2298_v36 = vsub.f32 0.0, %v2275_v29 }
 0x8e3   : > { %v3774_v9 = vpop.eup %3773  ;;  %v2338_v43 = vadd.f32 1.0, %v3772_v56  ;;  %3793 = vpow2.f32 %v2324_v31  ;;  %v2330_v20 = vmul.f32 1.442695, %v2299_v27 }
 0x8e4   : > { %v3776_v18 = vpop.eup %3775  ;;  %v2341_v33 = vadd.f32 1.0, %v3774_v9  ;;  %v2328_v35 = vmul.f32 1.442695, %v2298_v36 }
 0x8e5   : > { %v3778_v30 = vpop.eup %3777  ;;  %2367 = vst [vmem:[%s4588_s20 + $0x18] sm:$0xff] %v3776_v18  ;;  %3795 = vrcp.f32 %v2338_v43 }
 0x8e6   : > { %v3780_v50 = vpop.eup %3779  ;;  %2366 = vst [vmem:[%s4588_s20 + $0x10] sm:$0xff] %v3778_v30  ;;  %3797 = vrcp.f32 %v2341_v33 }
 0x8e7   : > { %v3782_v15 = vpop.eup %3781  ;;  %v2340_v44 = vadd.f32 1.0, %v3780_v50  ;;  %3799 = vpow2.f32 %v2330_v20 }
 0x8e8   : > { %v3784_v51 = vpop.eup %3783  ;;  %v2343_v26 = vadd.f32 1.0, %v3782_v15  ;;  %3801 = vpow2.f32 %v2328_v35 }
 0x8e9   : > { %v3786_v24 = vpop.eup %3785  ;;  %2369 = vst [vmem:[%s4588_s20 + $0x28] sm:$0xff] %v3784_v51  ;;  %3803 = vrcp.f32 %v2340_v44 }
 0x8ea   : > { %v3788_v58 = vpop.eup %3787  ;;  %2368 = vst [vmem:[%s4588_s20 + $0x20] sm:$0xff] %v3786_v24  ;;  %3805 = vrcp.f32 %v2343_v26 }
 0x8eb   : > { %v3790_v13 = vpop.eup %3789  ;;  %v2342_v63 = vadd.f32 1.0, %v3788_v58 }
 0x8ec   : > { %v3792_v32 = vpop.eup %3791  ;;  %v2345_v54 = vadd.f32 1.0, %v3790_v13 }
 0x8ed   : > { %v3794_v55 = vpop.eup %3793  ;;  %2371 = vst [vmem:[%s4588_s20 + $0x38] sm:$0xff] %v3792_v32  ;;  %3807 = vrcp.f32 %v2342_v63 }
 0x8ee   : > { %3809 = vrcp.f32 %v2345_v54  ;;  %v2344_v45 = vadd.f32 1.0, %v3794_v55 }
 0x8ef   : > { %v3796_v41 = vpop.eup %3795 }
 0x8f0   : > { %v3798_v39 = vpop.eup %3797  ;;  %2370 = vst [vmem:[%s4588_s20 + $0x30] sm:$0xff] %v3796_v41  ;;  %3811 = vrcp.f32 %v2344_v45 }
 0x8f1   : > { %v3800_v38 = vpop.eup %3799  ;;  %2373 = vst [vmem:[%s4588_s20 + $0x48] sm:$0xff] %v3798_v39 }
 0x8f2   : > { %v3802_v49 = vpop.eup %3801  ;;  %v2347_v7 = vadd.f32 1.0, %v3800_v38 }
 0x8f3   : > { %v3804_v46 = vpop.eup %3803  ;;  %v2346_v60 = vadd.f32 1.0, %v3802_v49 }
 0x8f4   : > { %v3806_v62 = vpop.eup %3805  ;;  %2372 = vst [vmem:[%s4588_s20 + $0x40] sm:$0xff] %v3804_v46  ;;  %3813 = vrcp.f32 %v2347_v7 }
 0x8f5   : > { %2375 = vst [vmem:[%s4588_s20 + $0x58] sm:$0xff] %v3806_v62  ;;  %3815 = vrcp.f32 %v2346_v60 }
 0x8f7   : > { %v3808_v4 = vpop.eup %3807 }
 0x8f8   : > { %v3810_v57 = vpop.eup %3809  ;;  %2374 = vst [vmem:[%s4588_s20 + $0x50] sm:$0xff] %v3808_v4 }
 0x8f9   : > { %2377 = vst [vmem:[%s4588_s20 + $0x68] sm:$0xff] %v3810_v57 }
 0x8fa   : > { %v3812_v25 = vpop.eup %3811 }
 0x8fb   : > { %2376 = vst [vmem:[%s4588_s20 + $0x60] sm:$0xff] %v3812_v25 }
 0x8fe   : > { %v3814_v3 = vpop.eup %3813 }
 0x8ff   : > { %v3816_v28 = vpop.eup %3815  ;;  %2379 = vst [vmem:[%s4588_s20 + $0x78] sm:$0xff] %v3814_v3 }
 0x900   : > { %2378 = vst [vmem:[%s4588_s20 + $0x70] sm:$0xff] %v3816_v28 }
 0x901   : > { %3858 = shalt.err (!%p3855_p6)
}
 0x902   : > { %s3859_s17 = scalar_lea.hbm %s4609_s28, 2048  ;;  %s3863_s15 = scalar_lea.hbm %s4669_s6, 8192 }
 0x903   : > { %p3860_p7 = scmp.ne.s32.totalorder %s4609_s28, %s3859_s17  ;;  %p3864_p0 = scmp.lt.u32.totalorder %s4609_s28, %s4669_s6 }
 0x904   : > { %p3865_p2 = scmp.lt.u32.totalorder %s3863_s15, %s3859_s17  ;;  %p3867_p8 = scmp.lt.u32.totalorder %s3859_s17, %s4609_s28 }
 0x905   : > { %p3861_p9 = pnand %p3860_p7, %p4681_p10 }
 0x906   : > { %p3866_p4 = por %p3865_p2, %p3864_p0 }
 0x907   : > { %p3862_p12 = pneg %p3861_p9 }
 0x908   : > { %p3868_p11 = por %p3867_p8, %p3866_p4 }
 0x90a   : > { %p3869_p13 = pnand %p3868_p11, %p3862_p12 }
 0x90c   : > { %3872 = shalt.err (!%p3869_p13)
}
 0x90d   : > { %s3933_s27 = smov 128   ;;  %s3934_s12 = smov 8  }
 0x90e   : > { %3687 = dma.vmem_to_hbm [thread:$0]  (%p4681_p10), %s4611_s11, 2048, %s4609_s28, %s4617_s30, %s3933_s27, %s3933_s27, %s3934_s12  }
 0x90f PF: > { %p3699_p1 = scmp.ge.s32.totalorder %s3927_s26, 2  ;;  %s2410_s24 = sand.u32 1, %s3907_s21  }
 0x910   : > { %p4682_p3 = scmp.ne.s32.totalorder %s4675_s9, 0  ;;  %s2411_s8 = scalar_lea.sflag [#allocation5], %s2410_s24 }
 0x912   : > { %p3694_p5 = pnand %p3699_p1, %p4682_p3 }
 0x914   : > { %3902 = dma.done.wait (!%p3694_p5), %s2411_s8, 2048  }
 0x915   : > { %3904 = vsyncadd (!%p3694_p5), %s2411_s8, 4294965248  ;;  %s20_s26 = sadd.s32 1, %s3927_s26   ;;  %s4683_s21 = smov %s3911_s22 }
 0x916   : > { %p17_p6 = scmp.ge.s32.totalorder %s20_s26, 6   ;;  %s4684_s22 = smov %s3915_s23 }
 0x917   : > { %s4685_s23 = smov %s4023_s10  ;;  %s4686_s24 = smov %s3923_s25 }
 0x918   : > { %s4687_s25 = smov %s4689_s29  ;;  %19 = sbr.rel (!%p17_p6) target bundleno = 5 (0x5), region = 105 }
 0x91f   :  { %2416 = vsyncpa [#allocation4], 1 }
 0x920   :  { %2418 = vsyncpa [#allocation4 + $0x1], 1 }
 0x921   :  { %2419 = vsyncpa [#allocation5], 1 }
 0x922   :  { %2421 = vsyncpa [#allocation5 + $0x1], 1 }

</bundles_post_ra>
